<compile_context>
chip_gen: v5e
topology: v5e:2x2
jax: 0.10.0
libtpu: 0.0.40
codegen_flags: <defaults>
</compile_context>

<pallas_src>
import functools

import jax
import jax.numpy as jnp
from jax.experimental import pallas as pl
from jax.experimental.pallas import tpu as pltpu

LOG_STD_MIN = -20.0
LOG_STD_MAX = 2.0


# ---------------------------------------------------------------------------
# Kernel
# ---------------------------------------------------------------------------
def _actor_kernel(s_ref,
                  w1_ref, b1_ref,
                  w2_ref, b2_ref,
                  w3_ref, b3_ref,
                  wh_ref, bh_ref,
                  out_ref,
                  *, state_dim, action_dim):
    x = s_ref[...]                                           # (TB, state_dim) f32

    # --- layer 1 on the VPU: K=state_dim(=2) would be >98% MXU padding --------------
    h = x[:, 0:1] * w1_ref[0:1, :] + b1_ref[...]             # (TB, hidden) f32
    for k in range(1, state_dim):                            # unrolled, state_dim static
        h = h + x[:, k:k + 1] * w1_ref[k:k + 1, :]
    h = jnp.maximum(h, 0.0)

    # --- layers 2 & 3 on the MXU: bf16 in, f32 accumulate, f32 epilogue -------------
    h = jnp.dot(h.astype(jnp.bfloat16), w2_ref[...],
                preferred_element_type=jnp.float32) + b2_ref[...]
    h = jnp.maximum(h, 0.0)
    h = jnp.dot(h.astype(jnp.bfloat16), w3_ref[...],
                preferred_element_type=jnp.float32) + b3_ref[...]
    h = jnp.maximum(h, 0.0)

    # --- fused heads: one lane-dense matmul ------------------------------------------
    # wh columns: [0, action_dim) = mean weights, [action_dim, 2*action_dim) = log_std
    # weights, rest zero-padded to 128 lanes.
    raw = jnp.dot(h.astype(jnp.bfloat16), wh_ref[...],
                  preferred_element_type=jnp.float32) + bh_ref[...]   # (TB, HEAD_PAD)
    std = jnp.exp(jnp.clip(raw, LOG_STD_MIN, LOG_STD_MAX))            # EUP, cheap
    col = jax.lax.broadcasted_iota(jnp.int32, raw.shape, 1)
    combined = jnp.where(col < action_dim, raw,
                         jnp.where(col < 2 * action_dim, std, 0.0))   # mean | std | 0

    # --- transpose so batch sits on lanes; store only 8 sublanes (tiny writeback) ----
    t = combined.T                                                    # (HEAD_PAD, TB), XLU
    out_ref[...] = t[0:out_ref.shape[0], :]                          # (OUT_ROWS, TB)


# ---------------------------------------------------------------------------
# Wrapper
# ---------------------------------------------------------------------------
def _plan_batch(batch):
    """Pad batch to a multiple of 128; pick a tile preferring >=2 grid steps (v7x megacore)."""
    b_pad = max(128, ((batch + 127) // 128) * 128)
    for cand in (2048, 1024, 512, 256, 128):
        if b_pad % cand == 0 and b_pad // cand >= 2:
            return b_pad, cand
    # Only reachable for b_pad == 128: single tile, single grid step.
    return b_pad, b_pad


def actor_forward(state, kparams):
    """state: (B, state_dim) f32. kparams: packed kernel params (see pack_actor_params).

    Returns (mean, std), each (B, action_dim) f32.
    """
    B, state_dim = state.shape
    action_dim = kparams["action_dim"]
    hidden = kparams["w2"].shape[0]
    head_pad = kparams["wh"].shape[1]
    out_rows = kparams["out_rows"]

    b_pad, tb = _plan_batch(B)
    if b_pad != B:
        state = jnp.pad(state, ((0, b_pad - B), (0, 0)))
    grid = (b_pad // tb,)

    def resident(shape):
        # Full-array block with a constant block index: stays VMEM-resident across all
        # grid steps (weights are not re-DMA'd per batch tile).
        return pl.BlockSpec(shape, lambda i: (0, 0))

    in_specs = [
        pl.BlockSpec((tb, state_dim), lambda i: (i, 0)),
        resident((state_dim, hidden)), resident((1, hidden)),
        resident((hidden, hidden)), resident((1, hidden)),
        resident((hidden, hidden)), resident((1, hidden)),
        resident((hidden, head_pad)), resident((1, head_pad)),
    ]

    out = pl.pallas_call(
        functools.partial(_actor_kernel, state_dim=state_dim, action_dim=action_dim),
        out_shape=jax.ShapeDtypeStruct((out_rows, b_pad), jnp.float32),
        grid=grid,
        in_specs=in_specs,
        out_specs=pl.BlockSpec((out_rows, tb), lambda i: (0, i)),
        compiler_params=pltpu.CompilerParams(
            dimension_semantics=("parallel",),
            vmem_limit_bytes=32 * 1024 * 1024),
    )(state,
      kparams["w1"], kparams["b1"],
      kparams["w2"], kparams["b2"],
      kparams["w3"], kparams["b3"],
      kparams["wh"], kparams["bh"])

    mean = out[:action_dim, :B].T
    std = out[action_dim:2 * action_dim, :B].T
    return mean, std


# ---------------------------------------------------------------------------
# Params (deterministic synthetic init, nn.Linear-style fan-in scale)
# ---------------------------------------------------------------------------
def init_actor_params(key, state_dim, action_dim, hidden_dim=256):
    """f32 params, weights stored (in_features, out_features), biases (1, out_features)."""
    def linear(k, fan_in, fan_out):
        kw, kb = jax.random.split(k)
        bound = 1.0 / jnp.sqrt(fan_in)
        w = jax.random.uniform(kw, (fan_in, fan_out), jnp.float32, -bound, bound)
        b = jax.random.uniform(kb, (1, fan_out), jnp.float32, -bound, bound)
        return w, b

    k1, k2, k3, km, ks = jax.random.split(key, 5)
    w1, b1 = linear(k1, state_dim, hidden_dim)
    w2, b2 = linear(k2, hidden_dim, hidden_dim)
    w3, b3 = linear(k3, hidden_dim, hidden_dim)
    wm, bm = linear(km, hidden_dim, action_dim)
    ws, bs = linear(ks, hidden_dim, action_dim)
    return dict(w1=w1, b1=b1, w2=w2, b2=b2, w3=w3, b3=b3,
                wm=wm, bm=bm, ws=ws, bs=bs)


def pack_actor_params(p):
    """Pack f32 params for the kernel: bf16 hidden weights + fused lane-dense head."""
    action_dim = p["wm"].shape[1]
    hidden = p["w2"].shape[0]
    head_pad = max(128, ((2 * action_dim + 127) // 128) * 128)
    out_rows = max(8, ((2 * action_dim + 7) // 8) * 8)     # sublane-aligned output rows

    wh = jnp.zeros((hidden, head_pad), jnp.float32)
    wh = wh.at[:, :action_dim].set(p["wm"])
    wh = wh.at[:, action_dim:2 * action_dim].set(p["ws"])
    bh = jnp.zeros((1, head_pad), jnp.float32)
    bh = bh.at[:, :action_dim].set(p["bm"])
    bh = bh.at[:, action_dim:2 * action_dim].set(p["bs"])

    return dict(
        w1=p["w1"], b1=p["b1"],                          # layer-1 done on VPU, keep f32
        w2=p["w2"].astype(jnp.bfloat16), b2=p["b2"],
        w3=p["w3"].astype(jnp.bfloat16), b3=p["b3"],
        wh=wh.astype(jnp.bfloat16), bh=bh,
        action_dim=action_dim,
        out_rows=out_rows,
    )


# ---------------------------------------------------------------------------
# References
# ---------------------------------------------------------------------------
def actor_forward_ref_f32(state, p):
    """Pure-f32 PyTorch-equivalent math (semantic reference)."""
    h = jnp.maximum(state @ p["w1"] + p["b1"], 0.0)
    h = jnp.maximum(h @ p["w2"] + p["b2"], 0.0)
    h = jnp.maximum(h @ p["w3"] + p["b3"], 0.0)
    mean = h @ p["wm"] + p["bm"]
    log_std = jnp.clip(h @ p["ws"] + p["bs"], LOG_STD_MIN, LOG_STD_MAX)
    return mean, jnp.exp(log_std)


def actor_forward_ref_emul(state, kp):
    """Plain-JAX emulation of the exact kernel numerics (bf16 MXU path, VPU layer 1)."""
    state_dim = kp["w1"].shape[0]
    action_dim = kp["action_dim"]
    h = state[:, 0:1] * kp["w1"][0:1, :] + kp["b1"]
    for k in range(1, state_dim):
        h = h + state[:, k:k + 1] * kp["w1"][k:k + 1, :]
    h = jnp.maximum(h, 0.0)
    h = jnp.maximum(jnp.dot(h.astype(jnp.bfloat16), kp["w2"],
                            preferred_element_type=jnp.float32) + kp["b2"], 0.0)
    h = jnp.maximum(jnp.dot(h.astype(jnp.bfloat16), kp["w3"],
                            preferred_element_type=jnp.float32) + kp["b3"], 0.0)
    raw = jnp.dot(h.astype(jnp.bfloat16), kp["wh"],
                  preferred_element_type=jnp.float32) + kp["bh"]
    mean = raw[:, :action_dim]
    std = jnp.exp(jnp.clip(raw[:, action_dim:2 * action_dim], LOG_STD_MIN, LOG_STD_MAX))
    return mean, std


# ---------------------------------------------------------------------------
if __name__ == "__main__":
    # MountainCarContinuous-style dims: state_dim=2, action_dim=1, hidden=256.
    B, state_dim, action_dim, hidden_dim = 8, 2, 1, 256

    key = jax.random.PRNGKey(0)
    kparam_key, kstate_key = jax.random.split(key)
    params = init_actor_params(kparam_key, state_dim, action_dim, hidden_dim)
    kparams = pack_actor_params(params)
    state = jax.random.normal(kstate_key, (B, state_dim), jnp.float32)

    mean, std = actor_forward(state, kparams)
    jax.block_until_ready((mean, std))

    assert mean.shape == (B, action_dim) and std.shape == (B, action_dim)
    assert bool(jnp.all(std > 0.0))

    # Tight check vs. a plain-JAX emulation of the exact kernel numerics.
    mean_e, std_e = actor_forward_ref_emul(state, kparams)
    assert jnp.allclose(mean, mean_e, atol=2e-3, rtol=2e-3)
    assert jnp.allclose(std, std_e, atol=2e-3, rtol=2e-3)

    # Loose semantic check vs. the pure-f32 PyTorch math (bf16 quantization only).
    mean_f, std_f = actor_forward_ref_f32(state, params)
    assert jnp.allclose(mean, mean_f, atol=5e-2, rtol=5e-2)
    assert jnp.allclose(std, std_f, atol=5e-2, rtol=5e-2)

    print("KERNEL_OK")
</pallas_src>

<mosaic_0001>
module attributes {stable_mosaic.version = 11 : i64} {
  func.func @_actor_kernel(%arg0: i32, %arg1: memref<128x2xf32, #tpu.memory_space<vmem>>, %arg2: memref<2x256xf32, #tpu.memory_space<vmem>>, %arg3: memref<1x256xf32, #tpu.memory_space<vmem>>, %arg4: memref<256x256xbf16, #tpu.memory_space<vmem>>, %arg5: memref<1x256xf32, #tpu.memory_space<vmem>>, %arg6: memref<256x256xbf16, #tpu.memory_space<vmem>>, %arg7: memref<1x256xf32, #tpu.memory_space<vmem>>, %arg8: memref<256x128xbf16, #tpu.memory_space<vmem>>, %arg9: memref<1x128xf32, #tpu.memory_space<vmem>>, %arg10: memref<8x128xf32, #tpu.memory_space<vmem>>) attributes {dimension_semantics = [#tpu.dimension_semantics<parallel>], iteration_bounds = array<i64: 1>, scalar_prefetch = 0 : i64, scratch_operands = 0 : i64, tpu.core_type = #tpu.core_type<tc>, window_params = [{transform_indices = @transform_0, window_bounds = array<i64: 128, 2>}, {pipeline_mode = #tpu.pipeline_mode<synchronous>, transform_indices = @transform_1, window_bounds = array<i64: 2, 256>}, {pipeline_mode = #tpu.pipeline_mode<synchronous>, transform_indices = @transform_2, window_bounds = array<i64: 1, 256>}, {pipeline_mode = #tpu.pipeline_mode<synchronous>, transform_indices = @transform_3, window_bounds = array<i64: 256, 256>}, {pipeline_mode = #tpu.pipeline_mode<synchronous>, transform_indices = @transform_4, window_bounds = array<i64: 1, 256>}, {pipeline_mode = #tpu.pipeline_mode<synchronous>, transform_indices = @transform_5, window_bounds = array<i64: 256, 256>}, {pipeline_mode = #tpu.pipeline_mode<synchronous>, transform_indices = @transform_6, window_bounds = array<i64: 1, 256>}, {pipeline_mode = #tpu.pipeline_mode<synchronous>, transform_indices = @transform_7, window_bounds = array<i64: 256, 128>}, {pipeline_mode = #tpu.pipeline_mode<synchronous>, transform_indices = @transform_8, window_bounds = array<i64: 1, 128>}, {transform_indices = @transform_9, window_bounds = array<i64: 8, 128>}]} {
    %c0 = arith.constant 0 : index
    %c0_0 = arith.constant 0 : index
    %0 = vector.load %arg1[%c0, %c0_0] : memref<128x2xf32, #tpu.memory_space<vmem>>, vector<128x2xf32>
    %1 = vector.extract_strided_slice %0 {offsets = [0, 0], sizes = [128, 1], strides = [1, 1]} : vector<128x2xf32> to vector<128x1xf32>
    %c0_1 = arith.constant 0 : index
    %c0_2 = arith.constant 0 : index
    %2 = vector.load %arg2[%c0_1, %c0_2] : memref<2x256xf32, #tpu.memory_space<vmem>>, vector<1x256xf32>
    %3 = vector.broadcast %1 : vector<128x1xf32> to vector<128x256xf32>
    %4 = vector.broadcast %2 : vector<1x256xf32> to vector<128x256xf32>
    %5 = arith.mulf %3, %4 : vector<128x256xf32>
    %c0_3 = arith.constant 0 : index
    %c0_4 = arith.constant 0 : index
    %6 = vector.load %arg3[%c0_3, %c0_4] : memref<1x256xf32, #tpu.memory_space<vmem>>, vector<1x256xf32>
    %7 = vector.broadcast %6 : vector<1x256xf32> to vector<128x256xf32>
    %8 = arith.addf %5, %7 : vector<128x256xf32>
    %9 = vector.extract_strided_slice %0 {offsets = [0, 1], sizes = [128, 1], strides = [1, 1]} : vector<128x2xf32> to vector<128x1xf32>
    %c1 = arith.constant 1 : index
    %c0_5 = arith.constant 0 : index
    %10 = vector.load %arg2[%c1, %c0_5] : memref<2x256xf32, #tpu.memory_space<vmem>>, vector<1x256xf32>
    %11 = vector.broadcast %9 : vector<128x1xf32> to vector<128x256xf32>
    %12 = vector.broadcast %10 : vector<1x256xf32> to vector<128x256xf32>
    %13 = arith.mulf %11, %12 : vector<128x256xf32>
    %14 = arith.addf %8, %13 : vector<128x256xf32>
    %cst = arith.constant 0.000000e+00 : f32
    %15 = vector.broadcast %cst : f32 to vector<128x256xf32>
    %16 = arith.maximumf %14, %15 : vector<128x256xf32>
    %17 = arith.truncf %16 : vector<128x256xf32> to vector<128x256xbf16>
    %c0_6 = arith.constant 0 : index
    %c0_7 = arith.constant 0 : index
    %18 = vector.load %arg4[%c0_6, %c0_7] : memref<256x256xbf16, #tpu.memory_space<vmem>>, vector<256x256xbf16>
    %cst_8 = arith.constant dense<0.000000e+00> : vector<128x256xf32>
    %19 = tpu.matmul %17, %18, %cst_8 {dimension_numbers = #tpu.dot_dimension_numbers<[1], [0], [0], [1], [0, 0, 1, 1], [], []>} : vector<128x256xbf16>, vector<256x256xbf16>, vector<128x256xf32> -> vector<128x256xf32>
    %c0_9 = arith.constant 0 : index
    %c0_10 = arith.constant 0 : index
    %20 = vector.load %arg5[%c0_9, %c0_10] : memref<1x256xf32, #tpu.memory_space<vmem>>, vector<1x256xf32>
    %21 = vector.broadcast %20 : vector<1x256xf32> to vector<128x256xf32>
    %22 = arith.addf %19, %21 : vector<128x256xf32>
    %cst_11 = arith.constant 0.000000e+00 : f32
    %23 = vector.broadcast %cst_11 : f32 to vector<128x256xf32>
    %24 = arith.maximumf %22, %23 : vector<128x256xf32>
    %25 = arith.truncf %24 : vector<128x256xf32> to vector<128x256xbf16>
    %c0_12 = arith.constant 0 : index
    %c0_13 = arith.constant 0 : index
    %26 = vector.load %arg6[%c0_12, %c0_13] : memref<256x256xbf16, #tpu.memory_space<vmem>>, vector<256x256xbf16>
    %cst_14 = arith.constant dense<0.000000e+00> : vector<128x256xf32>
    %27 = tpu.matmul %25, %26, %cst_14 {dimension_numbers = #tpu.dot_dimension_numbers<[1], [0], [0], [1], [0, 0, 1, 1], [], []>} : vector<128x256xbf16>, vector<256x256xbf16>, vector<128x256xf32> -> vector<128x256xf32>
    %c0_15 = arith.constant 0 : index
    %c0_16 = arith.constant 0 : index
    %28 = vector.load %arg7[%c0_15, %c0_16] : memref<1x256xf32, #tpu.memory_space<vmem>>, vector<1x256xf32>
    %29 = vector.broadcast %28 : vector<1x256xf32> to vector<128x256xf32>
    %30 = arith.addf %27, %29 : vector<128x256xf32>
    %cst_17 = arith.constant 0.000000e+00 : f32
    %31 = vector.broadcast %cst_17 : f32 to vector<128x256xf32>
    %32 = arith.maximumf %30, %31 : vector<128x256xf32>
    %33 = arith.truncf %32 : vector<128x256xf32> to vector<128x256xbf16>
    %c0_18 = arith.constant 0 : index
    %c0_19 = arith.constant 0 : index
    %34 = vector.load %arg8[%c0_18, %c0_19] : memref<256x128xbf16, #tpu.memory_space<vmem>>, vector<256x128xbf16>
    %cst_20 = arith.constant dense<0.000000e+00> : vector<128x128xf32>
    %35 = tpu.matmul %33, %34, %cst_20 {dimension_numbers = #tpu.dot_dimension_numbers<[1], [0], [0], [1], [0, 0, 1, 1], [], []>} : vector<128x256xbf16>, vector<256x128xbf16>, vector<128x128xf32> -> vector<128x128xf32>
    %c0_21 = arith.constant 0 : index
    %c0_22 = arith.constant 0 : index
    %36 = vector.load %arg9[%c0_21, %c0_22] : memref<1x128xf32, #tpu.memory_space<vmem>>, vector<1x128xf32>
    %37 = vector.broadcast %36 : vector<1x128xf32> to vector<128x128xf32>
    %38 = arith.addf %35, %37 : vector<128x128xf32>
    %cst_23 = arith.constant -2.000000e+01 : f32
    %cst_24 = arith.constant 2.000000e+00 : f32
    %39 = vector.broadcast %cst_23 : f32 to vector<128x128xf32>
    %40 = arith.maximumf %39, %38 : vector<128x128xf32>
    %41 = vector.broadcast %cst_24 : f32 to vector<128x128xf32>
    %42 = arith.minimumf %41, %40 : vector<128x128xf32>
    %43 = math.exp %42 : vector<128x128xf32>
    %44 = tpu.iota {dimensions = array<i32: 1>} : vector<128x128xi32>
    %c1_i32 = arith.constant 1 : i32
    %45 = vector.broadcast %c1_i32 : i32 to vector<128x128xi32>
    %46 = arith.cmpi slt, %44, %45 : vector<128x128xi32>
    %c2_i32 = arith.constant 2 : i32
    %47 = vector.broadcast %c2_i32 : i32 to vector<128x128xi32>
    %48 = arith.cmpi slt, %44, %47 : vector<128x128xi32>
    %cst_25 = arith.constant 0.000000e+00 : f32
    %49 = vector.broadcast %cst_25 : f32 to vector<128x128xf32>
    %50 = arith.select %48, %43, %49 : vector<128x128xi1>, vector<128x128xf32>
    %51 = arith.select %46, %38, %50 : vector<128x128xi1>, vector<128x128xf32>
    %52 = tpu.transpose %51, [1, 0] : vector<128x128xf32> -> vector<128x128xf32>
    %53 = vector.extract_strided_slice %52 {offsets = [0, 0], sizes = [8, 128], strides = [1, 1]} : vector<128x128xf32> to vector<8x128xf32>
    %c0_26 = arith.constant 0 : index
    %c0_27 = arith.constant 0 : index
    %54 = vector.load %arg10[%c0_26, %c0_27] : memref<8x128xf32, #tpu.memory_space<vmem>>, vector<8x128xf32>
    tpu.vector_store %arg10[%c0_26, %c0_27], %53 {strides = array<i32>} : memref<8x128xf32, #tpu.memory_space<vmem>>, vector<8x128xf32>,
    return
  }
  func.func @transform_0(%arg0: i32) -> (i32, i32) {
    %c0_i32 = arith.constant 0 : i32
    %c0_i32_0 = arith.constant 0 : i32
    return %arg0, %c0_i32 : i32, i32
  }
  func.func @transform_1(%arg0: i32) -> (i32, i32) {
    %c0_i32 = arith.constant 0 : i32
    %c0_i32_0 = arith.constant 0 : i32
    %c0_i32_1 = arith.constant 0 : i32
    return %c0_i32, %c0_i32_0 : i32, i32
  }
  func.func @transform_2(%arg0: i32) -> (i32, i32) {
    %c0_i32 = arith.constant 0 : i32
    %c0_i32_0 = arith.constant 0 : i32
    %c0_i32_1 = arith.constant 0 : i32
    return %c0_i32, %c0_i32_0 : i32, i32
  }
  func.func @transform_3(%arg0: i32) -> (i32, i32) {
    %c0_i32 = arith.constant 0 : i32
    %c0_i32_0 = arith.constant 0 : i32
    %c0_i32_1 = arith.constant 0 : i32
    return %c0_i32, %c0_i32_0 : i32, i32
  }
  func.func @transform_4(%arg0: i32) -> (i32, i32) {
    %c0_i32 = arith.constant 0 : i32
    %c0_i32_0 = arith.constant 0 : i32
    %c0_i32_1 = arith.constant 0 : i32
    return %c0_i32, %c0_i32_0 : i32, i32
  }
  func.func @transform_5(%arg0: i32) -> (i32, i32) {
    %c0_i32 = arith.constant 0 : i32
    %c0_i32_0 = arith.constant 0 : i32
    %c0_i32_1 = arith.constant 0 : i32
    return %c0_i32, %c0_i32_0 : i32, i32
  }
  func.func @transform_6(%arg0: i32) -> (i32, i32) {
    %c0_i32 = arith.constant 0 : i32
    %c0_i32_0 = arith.constant 0 : i32
    %c0_i32_1 = arith.constant 0 : i32
    return %c0_i32, %c0_i32_0 : i32, i32
  }
  func.func @transform_7(%arg0: i32) -> (i32, i32) {
    %c0_i32 = arith.constant 0 : i32
    %c0_i32_0 = arith.constant 0 : i32
    %c0_i32_1 = arith.constant 0 : i32
    return %c0_i32, %c0_i32_0 : i32, i32
  }
  func.func @transform_8(%arg0: i32) -> (i32, i32) {
    %c0_i32 = arith.constant 0 : i32
    %c0_i32_0 = arith.constant 0 : i32
    %c0_i32_1 = arith.constant 0 : i32
    return %c0_i32, %c0_i32_0 : i32, i32
  }
  func.func @transform_9(%arg0: i32) -> (i32, i32) {
    %c0_i32 = arith.constant 0 : i32
    %c0_i32_0 = arith.constant 0 : i32
    return %c0_i32, %arg0 : i32, i32
  }
}

</mosaic_0001>

<bundles_post_ra>
// kernel: tpu_custom_call.1
= control target key start
LH: loop header
LB: loop body
LE: loop exit
PB: predicated region body
PF: predicated region fallthrough
CT: control target
= control target key end

     0   :  { %14 = vsyncpa [#allocation3], 0  ;;  %s2821_s0 = inlined_call_operand.vmem [shape: f32[128,2], index: 0, kind: input, shape index: {}]   ;;  %s2822_s1 = inlined_call_operand.vmem [shape: f32[2,256], index: 1, kind: input, shape index: {}]   ;;  %s2823_s2 = inlined_call_operand.vmem [shape: f32[1,256], index: 2, kind: input, shape index: {}]   ;;  %s2824_s3 = inlined_call_operand.hbm [shape: bf16[256,256], index: 3, kind: input, shape index: {}]   ;;  %s2825_s4 = inlined_call_operand.vmem [shape: f32[1,256], index: 4, kind: input, shape index: {}]   ;;  %s2826_s5 = inlined_call_operand.hbm [shape: bf16[256,256], index: 5, kind: input, shape index: {}]   ;;  %s2827_s6 = inlined_call_operand.hbm [shape: f32[1,256], index: 6, kind: input, shape index: {}]   ;;  %s2828_s7 = inlined_call_operand.vmem [shape: bf16[256,128], index: 7, kind: input, shape index: {}]   ;;  %s2829_s8 = inlined_call_operand.vmem [shape: f32[1,128], index: 8, kind: input, shape index: {}]   ;;  %s2830_s9 = inlined_call_operand.hbm [shape: f32[8,128], index: 9, kind: output, shape index: {}]  }
   0x1   :  { %15 = vsyncpa [#allocation6], 0 }
   0x2   :  { %16 = vsyncpa [#allocation4], 0  ;;  %s42_s11 = sshll.u32 %s2826_s5, 4  ;;  %s2276_s12 = smov [#allocation5]   ;;  %s43_s11 = int_to_ptr.hbm [resolvable:$true] %s42_s11 }
   0x3   :  { %s44_s13 = sshll.u32 %s2276_s12, 4  ;;  %s27_s16 = sshll.u32 %s2824_s3, 4  ;;  %s45_s13 = int_to_ptr.vmem [resolvable:$true] %s44_s13  ;;  %s28_s16 = int_to_ptr.hbm [resolvable:$true] %s27_s16 }
   0x4   :  { %s2277_s17 = smov 128   ;;  %s2278_s18 = smov 8  }
   0x5   :  { %50 = dma.hbm_to_vmem [thread:$0]  %s43_s11, 4096, %s45_s13, [#allocation6], %s2277_s17, %s2277_s17, %s2278_s18  }
   0x6   :  { %s2279_s19 = smov [#allocation2]   ;;  %s56_s23 = sshll.u32 %s2827_s6, 4  ;;  %s57_s23 = int_to_ptr.hbm [resolvable:$true] %s56_s23 }
   0x7   :  { %s29_s20 = sshll.u32 %s2279_s19, 4  ;;  %s2280_s5 = smov [#allocation7]   ;;  %s30_s20 = int_to_ptr.vmem [resolvable:$true] %s29_s20 }
   0x8   :  { %35 = dma.hbm_to_vmem [thread:$0]  %s28_s16, 4096, %s30_s20, [#allocation3], %s2277_s17, %s2277_s17, %s2278_s18  }
   0x9   :  { %s58_s24 = sshll.u32 %s2280_s5, 4  ;;  %s59_s24 = int_to_ptr.vmem [resolvable:$true] %s58_s24 }
   0xa   :  { %61 = dma.hbm_to_vmem [thread:$0]  %s57_s23, 32, %s59_s24, [#allocation6]  }
   0xb   :  { %2270 = dma.done.wait [#allocation3], 4096  }
   0xc   :  { %2271 = vsyncadd [#allocation3], 4294963200 }
   0xd   :  { %2272 = dma.done.wait [#allocation6], 4128  }
   0xe   :  { %2273 = vsyncadd [#allocation6], 4294963168  ;;  %v2281_v0 = vmov 1   ;;  %v2282_v1 = vmov 0   ;;  %v86_v2 = vld [vmem:[%s2821_s0 + $0x40] sm:$0xff]  ;;  %v88_v3 = vld [vmem:[%s2821_s0 + $0x50] sm:$0xff] }
   0xf   :  { %2124 = vset.pattern.permute.xlu1 %v2281_v0  ;;  %2123 = vset.pattern.permute.xlu0 %v2282_v1  ;;  %v87_v4 = vld [vmem:[%s2821_s0 + $0x48] sm:$0xff]  ;;  %v89_v5 = vld [vmem:[%s2821_s0 + $0x58] sm:$0xff]  ;;  %v90_v6 = vld [vmem:[%s2821_s0 + $0x60] sm:$0xff]  ;;  %s1687_s22 = sshll.u32 %s2830_s9, 4  ;;  %s1688_s22 = int_to_ptr.hbm [resolvable:$true] %s1687_s22 }
  0x10   :  { %2125 = vset.pattern.permute.xlu2 %v2282_v1  ;;  %285 = vperm.xlu1 %2124, %v86_v2   ;;  %v91_v7 = vld [vmem:[%s2821_s0 + $0x68] sm:$0xff]  ;;  %v92_v8 = vld [vmem:[%s2821_s0 + $0x70] sm:$0xff]  ;;  %v93_v9 = vld [vmem:[%s2821_s0 + $0x78] sm:$0xff] }
  0x11   :  { %137 = vperm.xlu0 %2123, %v86_v2   ;;  %147 = vperm.xlu2 %2125, %v88_v3   ;;  %v79_v10 = vld [vmem:[%s2821_s0 + $0x8] sm:$0xff]  ;;  %v78_v11 = vld [vmem:[%s2821_s0] sm:$0xff]  ;;  %v80_v12 = vld [vmem:[%s2821_s0 + $0x10] sm:$0xff] }
  0x12   :  { %v83_v13 = vld [vmem:[%s2821_s0 + $0x28] sm:$0xff]  ;;  %v81_v14 = vld [vmem:[%s2821_s0 + $0x18] sm:$0xff]  ;;  %v1757_v15 = vld [vmem:[#allocation2 + $0x70] sm:$0xf] }
  0x13   :  { %v2034_v16 = vld [vmem:[#allocation2 + $0x74] sm:$0xf0]  ;;  %v1821_v18 = vld [vmem:[#allocation2 + $0xf0] sm:$0xf]  ;;  %v1749_v20 = vld [vmem:[#allocation2 + $0x60] sm:$0xf] }
  0x14   :  { %v1758_v17 = vor.u32 %v2034_v16, %v1757_v15  ;;  %v2050_v19 = vld [vmem:[#allocation2 + $0xf4] sm:$0xf0]  ;;  %v2032_v22 = vld [vmem:[#allocation2 + $0x64] sm:$0xf0]  ;;  %v1813_v23 = vld [vmem:[#allocation2 + $0xe0] sm:$0xf] }
  0x15   :  { %v1822_v21 = vor.u32 %v2050_v19, %v1821_v18  ;;  %v2048_v24 = vld [vmem:[#allocation2 + $0xe4] sm:$0xf0]  ;;  %v1750_v25 = vor.u32 %v2032_v22, %v1749_v20  ;;  %v84_v26 = vld [vmem:[%s2821_s0 + $0x30] sm:$0xff]  ;;  %v82_v27 = vld [vmem:[%s2821_s0 + $0x20] sm:$0xff] }
  0x16   :  { %2099 = vmatpush.bf16.msra.mxu2 %v1758_v17  ;;  %631 = vmatpush.bf16.msra.mxu0 %v1758_v17  ;;  %v1814_v28 = vor.u32 %v2048_v24, %v1813_v23  ;;  %v1741_v29 = vld [vmem:[#allocation2 + $0x50] sm:$0xf]  ;;  %v2030_v30 = vld [vmem:[#allocation2 + $0x54] sm:$0xf0]  ;;  %v1733_v35 = vld [vmem:[#allocation2 + $0x40] sm:$0xf] }
  0x17   :  { %2107 = vmatpush.bf16.msra.mxu3 %v1822_v21  ;;  %680 = vmatpush.bf16.msra.mxu1 %v1822_v21  ;;  %v1805_v31 = vld [vmem:[#allocation2 + $0xd0] sm:$0xf]  ;;  %v2046_v32 = vld [vmem:[#allocation2 + $0xd4] sm:$0xf0]  ;;  %v1742_v33 = vor.u32 %v2030_v30, %v1741_v29  ;;  %v2028_v36 = vld [vmem:[#allocation2 + $0x44] sm:$0xf0] }
  0x18   :  { %289 = vperm.xlu1 %2124, %v87_v4   ;;  %v1806_v34 = vor.u32 %v2046_v32, %v1805_v31  ;;  %v1797_v37 = vld [vmem:[#allocation2 + $0xc0] sm:$0xf]  ;;  %v2044_v38 = vld [vmem:[#allocation2 + $0xc4] sm:$0xf0]  ;;  %v1734_v39 = vor.u32 %v2028_v36, %v1733_v35  ;;  %v1725_v41 = vld [vmem:[#allocation2 + $0x30] sm:$0xf] }
  0x19   :  { %142 = vperm.xlu0 %2123, %v87_v4   ;;  %152 = vperm.xlu2 %2125, %v89_v5   ;;  %v1798_v40 = vor.u32 %v2044_v38, %v1797_v37  ;;  %v2026_v42 = vld [vmem:[#allocation2 + $0x34] sm:$0xf0]  ;;  %v1789_v43 = vld [vmem:[#allocation2 + $0xb0] sm:$0xf]  ;;  %v1717_v47 = vld [vmem:[#allocation2 + $0x20] sm:$0xf] }
  0x1a   :  { %2100 = vmatpush.bf16.msra.mxu2 %v1750_v25  ;;  %632 = vmatpush.bf16.msra.mxu0 %v1750_v25  ;;  %v1726_v44 = vor.u32 %v2026_v42, %v1725_v41  ;;  %v2042_v45 = vld [vmem:[#allocation2 + $0xb4] sm:$0xf0]  ;;  %v2024_v48 = vld [vmem:[#allocation2 + $0x24] sm:$0xf0]  ;;  %v1781_v49 = vld [vmem:[#allocation2 + $0xa0] sm:$0xf] }
  0x1b   :  { %2108 = vmatpush.bf16.msra.mxu3 %v1814_v28  ;;  %681 = vmatpush.bf16.msra.mxu1 %v1814_v28  ;;  %v1790_v46 = vor.u32 %v2042_v45, %v1789_v43  ;;  %v1718_v50 = vor.u32 %v2024_v48, %v1717_v47  ;;  %v2040_v51 = vld [vmem:[#allocation2 + $0xa4] sm:$0xf0]  ;;  %v85_v52 = vld [vmem:[%s2821_s0 + $0x38] sm:$0xff]  ;;  %v1709_v54 = vld [vmem:[#allocation2 + $0x10] sm:$0xf] }
  0x1c   :  { %v1782_v53 = vor.u32 %v2040_v51, %v1781_v49  ;;  %v2022_v55 = vld [vmem:[#allocation2 + $0x14] sm:$0xf0]  ;;  %v1773_v56 = vld [vmem:[#allocation2 + $0x90] sm:$0xf]  ;;  %v1701_v60 = vld [vmem:[#allocation2] sm:$0xf] }
  0x1d   :  { %v1710_v57 = vor.u32 %v2022_v55, %v1709_v54  ;;  %v2038_v58 = vld [vmem:[#allocation2 + $0x94] sm:$0xf0]  ;;  %v2020_v61 = vld [vmem:[#allocation2 + $0x4] sm:$0xf0]  ;;  %v1765_v62 = vld [vmem:[#allocation2 + $0x80] sm:$0xf] }
  0x1e   :  { %2101 = vmatpush.bf16.msra.mxu2 %v1742_v33  ;;  %633 = vmatpush.bf16.msra.mxu0 %v1742_v33  ;;  %v1774_v59 = vor.u32 %v2038_v58, %v1773_v56  ;;  %v1702_v63 = vor.u32 %v2020_v61, %v1701_v60  ;;  %v2033_v4 = vld [vmem:[#allocation2 + $0x74] sm:$0xf]  ;;  %v1751_v15 = vld [vmem:[#allocation2 + $0x68] sm:$0xf0]  ;;  %v2047_v16 = vld [vmem:[#allocation2 + $0xe4] sm:$0xf] }
  0x1f   :  { %2109 = vmatpush.bf16.msra.mxu3 %v1806_v34  ;;  %682 = vmatpush.bf16.msra.mxu1 %v1806_v34  ;;  %v1698_v17 = vld [vmem:[%s2822_s1 + $0x1] ss:$2 sm:$0x3]  ;;  %v1815_v19 = vld [vmem:[#allocation2 + $0xe8] sm:$0xf0] }
  0x20   :  { %297 = vperm.xlu1 %2124, %v89_v5   ;;  %v2049_v5 = vld [vmem:[#allocation2 + $0xf4] sm:$0xf]  ;;  %v1818_v22 = vor.u32 %v2047_v16, %v1815_v19  ;;  %v2428_v25 = vperm.slane %v1698_v17, 0  ;;  %v1743_v35 = vld [vmem:[#allocation2 + $0x58] sm:$0xf0] }
  0x21   :  { %2126 = vset.pattern.permute.xlu0 %v2281_v0  ;;  %157 = vperm.xlu2 %2125, %v90_v6   ;;  %v2029_v34 = vld [vmem:[#allocation2 + $0x54] sm:$0xf]  ;;  %v1807_v38 = vld [vmem:[#allocation2 + $0xd8] sm:$0xf0]  ;;  %v1735_v54 = vld [vmem:[#allocation2 + $0x48] sm:$0xf0] }
  0x22   :  { %293 = vperm.xlu0 %2126, %v88_v3   ;;  %2102 = vmatpush.bf16.msra.mxu2 %v1734_v39  ;;  %v2045_v36 = vld [vmem:[#allocation2 + $0xd4] sm:$0xf]  ;;  %v1746_v37 = vor.u32 %v2029_v34, %v1743_v35  ;;  %v2043_v55 = vld [vmem:[#allocation2 + $0xc4] sm:$0xf]  ;;  %v1799_v58 = vld [vmem:[#allocation2 + $0xc8] sm:$0xf0] }
  0x23   :  { %2110 = vmatpush.bf16.msra.mxu3 %v1798_v40  ;;  %634 = vmatpush.bf16.msra.mxu0 %v1734_v39  ;;  %v1810_v41 = vor.u32 %v2045_v36, %v1807_v38  ;;  %v1727_v19 = vld [vmem:[#allocation2 + $0x38] sm:$0xf0]  ;;  %v2023_v35 = vld [vmem:[#allocation2 + $0x24] sm:$0xf]  ;;  %v1719_v36 = vld [vmem:[#allocation2 + $0x28] sm:$0xf0] }
  0x24   :  { %683 = vmatpush.bf16.msra.mxu1 %v1798_v40 }
  0x26   :  { %2103 = vmatpush.bf16.msra.mxu2 %v1726_v44 }
  0x27   :  { %635 = vmatpush.bf16.msra.mxu0 %v1726_v44  ;;  %2111 = vmatpush.bf16.msra.mxu3 %v1790_v46 }
  0x28   :  { %2127 = vset.pattern.permute.xlu1 %v2282_v1  ;;  %684 = vmatpush.bf16.msra.mxu1 %v1790_v46 }
  0x29   :  { %162 = vperm.xlu1 %2127, %v91_v7   ;;  %2128 = vset.pattern.permute.xlu2 %v2281_v0 }
  0x2a   :  { %305 = vperm.xlu0 %2126, %v91_v7   ;;  %301 = vperm.xlu2 %2128, %v90_v6   ;;  %v1823_v7 = vld [vmem:[#allocation2 + $0xf8] sm:$0xf0] }
  0x2b   :  { %2104 = vmatpush.bf16.msra.mxu2 %v1718_v50  ;;  %636 = vmatpush.bf16.msra.mxu0 %v1718_v50 }
  0x2c   :  { %2112 = vmatpush.bf16.msra.mxu3 %v1782_v53  ;;  %685 = vmatpush.bf16.msra.mxu1 %v1782_v53  ;;  %v2027_v53 = vld [vmem:[#allocation2 + $0x44] sm:$0xf] }
  0x2f   :  { %2105 = vmatpush.bf16.msra.mxu2 %v1710_v57  ;;  %637 = vmatpush.bf16.msra.mxu0 %v1710_v57  ;;  %v1738_v57 = vor.u32 %v2027_v53, %v1735_v54 }
  0x30   :  { %2113 = vmatpush.bf16.msra.mxu3 %v1774_v59  ;;  %686 = vmatpush.bf16.msra.mxu1 %v1774_v59 }
  0x31   :  { %167 = vperm.xlu1 %2127, %v92_v8  }
  0x32   :  { %309 = vperm.xlu0 %2126, %v92_v8   ;;  %2129 = vset.pattern.permute.xlu2 %v2282_v1  ;;  %v1826_v8 = vor.u32 %v2049_v5, %v1823_v7 }
  0x33   :  { %172 = vperm.xlu2 %2129, %v93_v9   ;;  %2106 = vmatpush.bf16.msra.mxu2 %v1702_v63 }
  0x34   :  { %638 = vmatpush.bf16.msra.mxu0 %v1702_v63 }
  0x39   :  { %2130 = vset.pattern.permute.xlu1 %v2281_v0 }
  0x3a   :  { %2131 = vset.pattern.permute.xlu0 %v2282_v1  ;;  %313 = vperm.xlu1 %2130, %v93_v9  }
  0x3b   :  { %102 = vperm.xlu0 %2131, %v79_v10   ;;  %97 = vperm.xlu2 %2129, %v78_v11  }
  0x42   :  { %253 = vperm.xlu1 %2130, %v78_v11  }
  0x43   :  { %2135 = vset.pattern.permute.xlu0 %v2281_v0  ;;  %2132 = vset.pattern.permute.xlu2 %v2281_v0 }
  0x44   :  { %261 = vperm.xlu0 %2135, %v80_v12   ;;  %257 = vperm.xlu2 %2132, %v79_v10   ;;  %v94_v10 = vld [vmem:[%s2822_s1] ss:$2 sm:$0x3] }
  0x45   :  { %v2414_v11 = vperm.slane %v94_v10, 0 }
  0x4a   :  { %2133 = vset.pattern.permute.xlu1 %v2282_v1 }
  0x4b   :  { %107 = vperm.xlu1 %2133, %v80_v12   ;;  %v2416_v12 = vperm.slane %v94_v10, 1 }
  0x4c   :  { %273 = vperm.xlu0 %2135, %v83_v13   ;;  %2134 = vset.pattern.permute.xlu2 %v2282_v1 }
  0x4d   :  { %112 = vperm.xlu2 %2134, %v81_v14  }
  0x53   :  { %2136 = vset.pattern.permute.xlu1 %v2281_v0 }
  0x54   :  { %277 = vperm.xlu0 %2135, %v84_v26   ;;  %265 = vperm.xlu1 %2136, %v81_v14   ;;  %v2031_v14 = vld [vmem:[#allocation2 + $0x64] sm:$0xf] }
  0x55   :  { %117 = vperm.xlu2 %2134, %v82_v27   ;;  %v1754_v18 = vor.u32 %v2031_v14, %v1751_v15 }
  0x5c   :  { %2137 = vset.pattern.permute.xlu1 %v2282_v1 }
  0x5d   :  { %122 = vperm.xlu1 %2137, %v83_v13   ;;  %2138 = vset.pattern.permute.xlu2 %v2281_v0  ;;  %v212_v13 = vld [vmem:[%s2823_s2] sm:$0x3] }
  0x5e   :  { %269 = vperm.xlu2 %2138, %v82_v27   ;;  %v2424_v23 = vperm.slane %v212_v13, 0  ;;  %v2426_v24 = vperm.slane %v212_v13, 1 }
  0x65   :  { %127 = vperm.xlu1 %2137, %v84_v26   ;;  %v2430_v26 = vperm.slane %v1698_v17, 1 }
  0x66   :  { %2139 = vset.pattern.permute.xlu2 %v2282_v1  ;;  %v2036_v1 = vld [vmem:[#allocation2 + $0x84] sm:$0xf0] }
  0x67   :  { %132 = vperm.xlu2 %2139, %v85_v52   ;;  %v1766_v2 = vor.u32 %v2036_v1, %v1765_v62 }
  0x69   :  { %2114 = vmatpush.bf16.msra.mxu3 %v1766_v2  ;;  %687 = vmatpush.bf16.msra.mxu1 %v1766_v2 }
  0x6b   :  { %v2409_v3 = vpop.permute.xlu2 %147 }
  0x6c   :  { %v200_v56 = vmul.f32 %v2414_v11, %v2409_v3  ;;  %v201_v63 = vmul.f32 %v2416_v12, %v2409_v3 }
  0x6d   :  { %2140 = vset.pattern.permute.xlu1 %v2281_v0  ;;  %v1759_v0 = vld [vmem:[#allocation2 + $0x78] sm:$0xf0]  ;;  %778 = vmatpush.bf16.msrb.mxu3 %v1826_v8 }
  0x6e   :  { %281 = vperm.xlu1 %2140, %v85_v52   ;;  %v1762_v6 = vor.u32 %v2033_v4, %v1759_v0  ;;  %v1802_v0 = vor.u32 %v2043_v55, %v1799_v58  ;;  %v238_v8 = vadd.f32 %v2424_v23, %v200_v56  ;;  %v239_v3 = vadd.f32 %v2426_v24, %v201_v63  ;;  %v2021_v55 = vld [vmem:[#allocation2 + $0x14] sm:$0xf]  ;;  %v1711_v56 = vld [vmem:[#allocation2 + $0x18] sm:$0xf0] }
  0x70   :  { %729 = vmatpush.bf16.msrb.mxu2 %v1762_v6 }
  0x71   :  { %779 = vmatpush.bf16.msrb.mxu3 %v1818_v22  ;;  %v1791_v22 = vld [vmem:[#allocation2 + $0xb8] sm:$0xf0] }
  0x73   :  { %v153_v9 = vpop.permute.xlu2 %152 }
  0x74   :  { %730 = vmatpush.bf16.msrb.mxu2 %v1754_v18  ;;  %v202_v1 = vmul.f32 %v2414_v11, %v153_v9  ;;  %v203_v2 = vmul.f32 %v2416_v12, %v153_v9  ;;  %v2025_v18 = vld [vmem:[#allocation2 + $0x34] sm:$0xf] }
  0x75   :  { %780 = vmatpush.bf16.msrb.mxu3 %v1810_v41 }
  0x76   :  { %v240_v10 = vadd.f32 %v2424_v23, %v202_v1  ;;  %v241_v9 = vadd.f32 %v2426_v24, %v203_v2  ;;  %v2037_v2 = vld [vmem:[#allocation2 + $0x94] sm:$0xf] }
  0x78   :  { %731 = vmatpush.bf16.msrb.mxu2 %v1746_v37  ;;  %v1722_v37 = vor.u32 %v2023_v35, %v1719_v36 }
  0x79   :  { %781 = vmatpush.bf16.msrb.mxu3 %v1802_v0  ;;  %v2019_v0 = vld [vmem:[#allocation2 + $0x4] sm:$0xf] }
  0x7b   :  { %v2434_v29 = vpop.permute.xlu2 %157 }
  0x7c   :  { %732 = vmatpush.bf16.msrb.mxu2 %v1738_v57  ;;  %v204_v53 = vmul.f32 %v2414_v11, %v2434_v29  ;;  %v205_v54 = vmul.f32 %v2416_v12, %v2434_v29  ;;  %v1714_v57 = vor.u32 %v2021_v55, %v1711_v56 }
  0x7e   :  { %v243_v29 = vadd.f32 %v2426_v24, %v205_v54 }
  0x82   :  { %v286_v20 = vpop.permute.xlu1 %285 }
  0x83   :  { %v138_v21 = vpop.permute.xlu0 %137  ;;  %v337_v30 = vmul.f32 %v2428_v25, %v286_v20  ;;  %v338_v31 = vmul.f32 %v2430_v26, %v286_v20  ;;  %v1730_v20 = vor.u32 %v2025_v18, %v1727_v19 }
  0x84   :  { %v196_v27 = vmul.f32 %v2414_v11, %v138_v21  ;;  %v197_v28 = vmul.f32 %v2416_v12, %v138_v21  ;;  %v2446_v50 = vpop.permute.xlu2 %301  ;;  %v2041_v21 = vld [vmem:[#allocation2 + $0xb4] sm:$0xf] }
  0x85   :  { %733 = vmatpush.bf16.msrb.mxu2 %v1730_v20  ;;  %v345_v63 = vmul.f32 %v2428_v25, %v2446_v50  ;;  %v346_v1 = vmul.f32 %v2430_v26, %v2446_v50 }
  0x86   :  { %v234_v32 = vadd.f32 %v2424_v23, %v196_v27  ;;  %v235_v33 = vadd.f32 %v2426_v24, %v197_v28  ;;  %v1794_v27 = vor.u32 %v2041_v21, %v1791_v22 }
  0x87   :  { %v378_v18 = vadd.f32 %v346_v1, %v243_v29 }
  0x88   :  { %v369_v44 = vadd.f32 %v337_v30, %v234_v32  ;;  %v370_v45 = vadd.f32 %v338_v31, %v235_v33  ;;  %782 = vmatpush.bf16.msrb.mxu3 %v1794_v27 }
  0x89   :  { %734 = vmatpush.bf16.msrb.mxu2 %v1722_v37  ;;  %v410_v37 = vmax.f32 %v378_v18, 0.0 }
  0x8a   :  { %v290_v39 = vpop.permute.xlu1 %289  ;;  %v401_v59 = vmax.f32 %v369_v44, 0.0  ;;  %v402_v61 = vmax.f32 %v370_v45, 0.0 }
  0x8b   :  { %v143_v40 = vpop.permute.xlu0 %142  ;;  %v339_v46 = vmul.f32 %v2428_v25, %v290_v39  ;;  %v340_v47 = vmul.f32 %v2430_v26, %v290_v39 }
  0x8c   :  { %v198_v42 = vmul.f32 %v2414_v11, %v143_v40  ;;  %v199_v43 = vmul.f32 %v2416_v12, %v143_v40 }
  0x8d   :  { %v2468_v17 = vpop.permute.xlu2 %172  ;;  %735 = vmatpush.bf16.msrb.mxu2 %v1714_v57 }
  0x8e   :  { %v236_v48 = vadd.f32 %v2424_v23, %v198_v42  ;;  %v237_v49 = vadd.f32 %v2426_v24, %v199_v43  ;;  %v2039_v42 = vld [vmem:[#allocation2 + $0xa4] sm:$0xf]  ;;  %v1783_v43 = vld [vmem:[#allocation2 + $0xa8] sm:$0xf0] }
  0x8f   :  { %v1786_v45 = vor.u32 %v2039_v42, %v1783_v43 }
  0x90   :  { %v371_v51 = vadd.f32 %v339_v46, %v236_v48  ;;  %v372_v52 = vadd.f32 %v340_v47, %v237_v49 }
  0x91   :  { %783 = vmatpush.bf16.msrb.mxu3 %v1786_v45 }
  0x92   :  { %v403_v60 = vmax.f32 %v371_v51, 0.0  ;;  %v404_v62 = vmax.f32 %v372_v52, 0.0  ;;  %v298_v4 = vpop.permute.xlu1 %297 }
  0x93   :  { %v343_v13 = vmul.f32 %v2428_v25, %v298_v4  ;;  %v344_v14 = vmul.f32 %v2430_v26, %v298_v4  ;;  %v1775_v4 = vld [vmem:[#allocation2 + $0x98] sm:$0xf0] }
  0x94   :  { %v294_v5 = vpop.permute.xlu0 %293  ;;  %v2454_v6 = vpack.c.bf16 %v403_v60, %v401_v59  ;;  %v2456_v7 = vpack.c.bf16 %v404_v62, %v402_v61  ;;  %v242_v62 = vadd.f32 %v2424_v23, %v204_v53 }
  0x95   :  { %v341_v15 = vmul.f32 %v2428_v25, %v294_v5  ;;  %v342_v16 = vmul.f32 %v2430_v26, %v294_v5  ;;  %v375_v28 = vadd.f32 %v343_v13, %v240_v10  ;;  %v376_v30 = vadd.f32 %v344_v14, %v241_v9  ;;  %v98_v44 = vpop.permute.xlu2 %97 }
  0x96   :  { %659 = vmatmul.bf16.vlgmr.msra.gmra.mxu2 %v2454_v6  ;;  %708 = vmatmul.bf16.vlgmr.msra.gmra.mxu3 %v2456_v7  ;;  %v1778_v5 = vor.u32 %v2037_v2, %v1775_v4  ;;  %v180_v50 = vmul.f32 %v2414_v11, %v98_v44  ;;  %v181_v21 = vmul.f32 %v2416_v12, %v98_v44 }
  0x97   :  { %v373_v31 = vadd.f32 %v341_v15, %v238_v8  ;;  %v374_v32 = vadd.f32 %v342_v16, %v239_v3  ;;  %v407_v39 = vmax.f32 %v375_v28, 0.0  ;;  %v408_v41 = vmax.f32 %v376_v30, 0.0  ;;  %v1703_v8 = vld [vmem:[#allocation2 + $0x8] sm:$0xf0] }
  0x98   :  { %v1706_v13 = vor.u32 %v2019_v0, %v1703_v8  ;;  %784 = vmatpush.bf16.msrb.mxu3 %v1778_v5  ;;  %v377_v16 = vadd.f32 %v345_v63, %v242_v62 }
  0x99   :  { %v405_v38 = vmax.f32 %v373_v31, 0.0  ;;  %v406_v40 = vmax.f32 %v374_v32, 0.0 }
  0x9a   :  { %736 = vmatpush.bf16.msrb.mxu2 %v1706_v13  ;;  %v409_v36 = vmax.f32 %v377_v16, 0.0 }
  0x9b   :  { %v163_v33 = vpop.permute.xlu1 %162  ;;  %v2472_v49 = vpack.c.bf16 %v407_v39, %v405_v38  ;;  %v2474_v51 = vpack.c.bf16 %v408_v41, %v406_v40  ;;  %v210_v38 = vmul.f32 %v2414_v11, %v2468_v17  ;;  %v211_v39 = vmul.f32 %v2416_v12, %v2468_v17 }
  0x9c   :  { %v306_v34 = vpop.permute.xlu0 %305  ;;  %v206_v46 = vmul.f32 %v2414_v11, %v163_v33  ;;  %v207_v47 = vmul.f32 %v2416_v12, %v163_v33  ;;  %v2035_v33 = vld [vmem:[#allocation2 + $0x84] sm:$0xf]  ;;  %v218_v40 = vadd.f32 %v2424_v23, %v180_v50  ;;  %v219_v41 = vadd.f32 %v2426_v24, %v181_v21 }
  0x9d   :  { %v347_v60 = vmul.f32 %v2428_v25, %v306_v34  ;;  %v348_v61 = vmul.f32 %v2430_v26, %v306_v34  ;;  %v1767_v34 = vld [vmem:[#allocation2 + $0x88] sm:$0xf0]  ;;  %v248_v55 = vadd.f32 %v2424_v23, %v210_v38  ;;  %v249_v56 = vadd.f32 %v2426_v24, %v211_v39  ;;  %v2065_v39 = vld [vmem:[#allocation5 + $0x74] sm:$0xf] }
  0x9e   :  { %v244_v58 = vadd.f32 %v2424_v23, %v206_v46  ;;  %v245_v59 = vadd.f32 %v2426_v24, %v207_v47  ;;  %v258_v9 = vpop.permute.xlu2 %257  ;;  %v1770_v35 = vor.u32 %v2035_v33, %v1767_v34 }
  0x9f   :  { %v323_v22 = vmul.f32 %v2428_v25, %v258_v9  ;;  %v324_v27 = vmul.f32 %v2430_v26, %v258_v9 }
  0xa0   :  { %v379_v3 = vadd.f32 %v347_v60, %v244_v58  ;;  %v380_v10 = vadd.f32 %v348_v61, %v245_v59  ;;  %785 = vmatpush.bf16.msrb.mxu3 %v1770_v35 }
  0xa2   :  { %v411_v31 = vmax.f32 %v379_v3, 0.0  ;;  %v412_v32 = vmax.f32 %v380_v10, 0.0 }
  0xa3   :  { %v168_v48 = vpop.permute.xlu1 %167 }
  0xa4   :  { %v2476_v52 = vpop.permute.xlu0 %309  ;;  %v2508_v44 = vpack.c.bf16 %v411_v31, %v409_v36  ;;  %v2510_v45 = vpack.c.bf16 %v412_v32, %v410_v37  ;;  %v208_v46 = vmul.f32 %v2414_v11, %v168_v48  ;;  %v209_v47 = vmul.f32 %v2416_v12, %v168_v48 }
  0xa5   :  { %v349_v4 = vmul.f32 %v2428_v25, %v2476_v52  ;;  %v350_v0 = vmul.f32 %v2430_v26, %v2476_v52 }
  0xa6   :  { %664 = vmatmul.bf16.gmra.mxu2 %v2472_v49  ;;  %713 = vmatmul.bf16.gmra.mxu3 %v2474_v51  ;;  %v246_v62 = vadd.f32 %v2424_v23, %v208_v46  ;;  %v247_v29 = vadd.f32 %v2426_v24, %v209_v47  ;;  %v1951_v46 = vld [vmem:[#allocation5 + $0xf8] sm:$0xf0] }
  0xa7   :  { %v113_v2 = vpop.permute.xlu2 %112 }
  0xa8   :  { %v381_v9 = vadd.f32 %v349_v4, %v246_v62  ;;  %v382_v13 = vadd.f32 %v350_v0, %v247_v29  ;;  %v187_v50 = vmul.f32 %v2416_v12, %v113_v2 }
  0xaa   :  { %v413_v21 = vmax.f32 %v381_v9, 0.0  ;;  %v225_v36 = vadd.f32 %v2426_v24, %v187_v50  ;;  %v2063_v50 = vld [vmem:[#allocation5 + $0x64] sm:$0xf] }
  0xac   :  { %v314_v14 = vpop.permute.xlu1 %313 }
  0xad   :  { %v103_v15 = vpop.permute.xlu0 %102  ;;  %v351_v57 = vmul.f32 %v2428_v25, %v314_v14  ;;  %v352_v58 = vmul.f32 %v2430_v26, %v314_v14 }
  0xae   :  { %v182_v19 = vmul.f32 %v2414_v11, %v103_v15  ;;  %v183_v20 = vmul.f32 %v2416_v12, %v103_v15 }
  0xaf   :  { %v383_v5 = vadd.f32 %v351_v57, %v248_v55  ;;  %v384_v8 = vadd.f32 %v352_v58, %v249_v56  ;;  %v118_v32 = vpop.permute.xlu2 %117 }
  0xb0   :  { %v220_v28 = vadd.f32 %v2424_v23, %v182_v19  ;;  %v221_v30 = vadd.f32 %v2426_v24, %v183_v20  ;;  %v186_v20 = vmul.f32 %v2414_v11, %v113_v2  ;;  %v188_v58 = vmul.f32 %v2414_v11, %v118_v32 }
  0xb1   :  { %v415_v19 = vmax.f32 %v383_v5, 0.0  ;;  %v416_v52 = vmax.f32 %v384_v8, 0.0 }
  0xb2   :  { %v355_v42 = vadd.f32 %v323_v22, %v220_v28  ;;  %v356_v43 = vadd.f32 %v324_v27, %v221_v30  ;;  %v414_v22 = vmax.f32 %v382_v13, 0.0  ;;  %v224_v35 = vadd.f32 %v2424_v23, %v186_v20 }
  0xb3   :  { %v2542_v33 = vpack.c.bf16 %v415_v19, %v413_v21  ;;  %v1879_v21 = vld [vmem:[#allocation5 + $0x68] sm:$0xf0] }
  0xb4   :  { %v254_v53 = vpop.permute.xlu1 %253  ;;  %v387_v48 = vmax.f32 %v355_v42, 0.0  ;;  %v388_v61 = vmax.f32 %v356_v43, 0.0  ;;  %v2544_v34 = vpack.c.bf16 %v416_v52, %v414_v22  ;;  %v2079_v22 = vld [vmem:[#allocation5 + $0xe4] sm:$0xf] }
  0xb5   :  { %v321_v54 = vmul.f32 %v2428_v25, %v254_v53  ;;  %v322_v17 = vmul.f32 %v2430_v26, %v254_v53 }
  0xb6   :  { %669 = vmatmul.bf16.gmra.mxu2 %v2508_v44  ;;  %718 = vmatmul.bf16.gmra.mxu3 %v2510_v45  ;;  %v262_v18 = vpop.permute.xlu0 %261 }
  0xb7   :  { %v353_v59 = vadd.f32 %v321_v54, %v218_v40  ;;  %v354_v60 = vadd.f32 %v322_v17, %v219_v41  ;;  %v325_v30 = vmul.f32 %v2428_v25, %v262_v18  ;;  %v326_v31 = vmul.f32 %v2430_v26, %v262_v18  ;;  %v1887_v40 = vld [vmem:[#allocation5 + $0x78] sm:$0xf0]  ;;  %v2081_v41 = vld [vmem:[#allocation5 + $0xf4] sm:$0xf] }
  0xb8   :  { %v1890_v43 = vor.u32 %v2065_v39, %v1887_v40  ;;  %v1954_v54 = vor.u32 %v2081_v41, %v1951_v46 }
  0xb9   :  { %v385_v63 = vmax.f32 %v353_v59, 0.0  ;;  %v386_v1 = vmax.f32 %v354_v60, 0.0  ;;  %v189_v59 = vmul.f32 %v2416_v12, %v118_v32 }
  0xba   :  { %1171 = vmatpush.bf16.msra.mxu2 %v1890_v43  ;;  %1220 = vmatpush.bf16.msra.mxu3 %v1954_v54 }
  0xbb   :  { %v2528_v3 = vpack.c.bf16 %v387_v48, %v385_v63  ;;  %v2530_v10 = vpack.c.bf16 %v388_v61, %v386_v1  ;;  %v270_v61 = vpop.permute.xlu2 %269  ;;  %v226_v63 = vadd.f32 %v2424_v23, %v188_v58  ;;  %v227_v2 = vadd.f32 %v2426_v24, %v189_v59  ;;  %v2061_v59 = vld [vmem:[#allocation5 + $0x54] sm:$0xf] }
  0xbc   :  { %v329_v1 = vmul.f32 %v2428_v25, %v270_v61  ;;  %v330_v5 = vmul.f32 %v2430_v26, %v270_v61  ;;  %v2077_v61 = vld [vmem:[#allocation5 + $0xd4] sm:$0xf] }
  0xbd   :  { %639 = vmatmul.bf16.vlgmr.msra.gmra.mxu0 %v2528_v3  ;;  %688 = vmatmul.bf16.vlgmr.msra.gmra.mxu1 %v2530_v10  ;;  %v108_v14 = vpop.permute.xlu1 %107 }
  0xbe   :  { %v184_v15 = vmul.f32 %v2414_v11, %v108_v14  ;;  %v185_v16 = vmul.f32 %v2416_v12, %v108_v14  ;;  %v274_v0 = vpop.permute.xlu0 %273  ;;  %v361_v18 = vadd.f32 %v329_v1, %v226_v63  ;;  %v362_v19 = vadd.f32 %v330_v5, %v227_v2  ;;  %v1935_v63 = vld [vmem:[#allocation5 + $0xd8] sm:$0xf0] }
  0xbf   :  { %v331_v13 = vmul.f32 %v2428_v25, %v274_v0  ;;  %v332_v14 = vmul.f32 %v2430_v26, %v274_v0 }
  0xc0   :  { %v222_v27 = vadd.f32 %v2424_v23, %v184_v15  ;;  %v223_v28 = vadd.f32 %v2426_v24, %v185_v16 }
  0xc2   :  { %v357_v37 = vadd.f32 %v325_v30, %v222_v27  ;;  %v358_v38 = vadd.f32 %v326_v31, %v223_v28  ;;  %v393_v27 = vmax.f32 %v361_v18, 0.0  ;;  %v1882_v28 = vor.u32 %v2063_v50, %v1879_v21  ;;  %v1943_v30 = vld [vmem:[#allocation5 + $0xe8] sm:$0xf0]  ;;  %v2073_v50 = vld [vmem:[#allocation5 + $0xb4] sm:$0xf] }
  0xc3   :  { %v1919_v21 = vld [vmem:[#allocation5 + $0xb8] sm:$0xf0] }
  0xc4   :  { %v389_v56 = vmax.f32 %v357_v37, 0.0  ;;  %v390_v57 = vmax.f32 %v358_v38, 0.0  ;;  %v1946_v37 = vor.u32 %v2079_v22, %v1943_v30  ;;  %1172 = vmatpush.bf16.msra.mxu2 %v1882_v28  ;;  %v133_v38 = vpop.permute.xlu2 %132  ;;  %v1949_v22 = vld [vmem:[#allocation5 + $0xf0] sm:$0xf]  ;;  %v2082_v28 = vld [vmem:[#allocation5 + $0xf4] sm:$0xf0] }
  0xc5   :  { %v1877_v30 = vld [vmem:[#allocation5 + $0x60] sm:$0xf] }
  0xc6   :  { %674 = vmatmul.bf16.gmra.mxu2 %v2542_v33  ;;  %723 = vmatmul.bf16.gmra.mxu3 %v2544_v34  ;;  %v266_v42 = vpop.permute.xlu1 %265  ;;  %v278_v43 = vpop.permute.xlu0 %277 }
  0xc7   :  { %v327_v47 = vmul.f32 %v2428_v25, %v266_v42  ;;  %v328_v53 = vmul.f32 %v2430_v26, %v266_v42  ;;  %1221 = vmatpush.bf16.msra.mxu3 %v1946_v37  ;;  %v1869_v37 = vld [vmem:[#allocation5 + $0x50] sm:$0xf] }
  0xc9   :  { %v359_v17 = vadd.f32 %v327_v47, %v224_v35  ;;  %v360_v55 = vadd.f32 %v328_v53, %v225_v36  ;;  %v394_v35 = vmax.f32 %v362_v19, 0.0  ;;  %v1885_v19 = vld [vmem:[#allocation5 + $0x70] sm:$0xf] }
  0xcb   :  { %v391_v60 = vmax.f32 %v359_v17, 0.0  ;;  %v392_v48 = vmax.f32 %v360_v55, 0.0 }
  0xcd   :  { %v419_v62 = vpack.c.bf16 %v391_v60, %v389_v56  ;;  %v420_v29 = vpack.c.bf16 %v392_v48, %v390_v57  ;;  %v1871_v60 = vld [vmem:[#allocation5 + $0x58] sm:$0xf0] }
  0xce   :  { %v1874_v48 = vor.u32 %v2061_v59, %v1871_v60  ;;  %v1845_v60 = vld [vmem:[#allocation5 + $0x20] sm:$0xf] }
  0xcf   :  { %644 = vmatmul.bf16.gmra.mxu0 %v419_v62  ;;  %693 = vmatmul.bf16.gmra.mxu1 %v420_v29  ;;  %v123_v4 = vpop.permute.xlu1 %122 }
  0xd0   :  { %v190_v8 = vmul.f32 %v2414_v11, %v123_v4  ;;  %v191_v9 = vmul.f32 %v2416_v12, %v123_v4  ;;  %v1938_v4 = vor.u32 %v2077_v61, %v1935_v63  ;;  %1173 = vmatpush.bf16.msra.mxu2 %v1874_v48  ;;  %v2056_v48 = vld [vmem:[#allocation5 + $0x24] sm:$0xf0]  ;;  %v1933_v61 = vld [vmem:[#allocation5 + $0xd0] sm:$0xf]  ;;  %v2078_v63 = vld [vmem:[#allocation5 + $0xd4] sm:$0xf0] }
  0xd2   :  { %v228_v15 = vadd.f32 %v2424_v23, %v190_v8  ;;  %v229_v16 = vadd.f32 %v2426_v24, %v191_v9  ;;  %1222 = vmatpush.bf16.msra.mxu3 %v1938_v4  ;;  %v2075_v9 = vld [vmem:[#allocation5 + $0xc4] sm:$0xf] }
  0xd4   :  { %v363_v52 = vadd.f32 %v331_v13, %v228_v15  ;;  %v364_v20 = vadd.f32 %v332_v14, %v229_v16  ;;  %v1927_v13 = vld [vmem:[#allocation5 + $0xc8] sm:$0xf0]  ;;  %v2057_v15 = vld [vmem:[#allocation5 + $0x34] sm:$0xf]  ;;  %v1855_v16 = vld [vmem:[#allocation5 + $0x38] sm:$0xf0] }
  0xd5   :  { %v1930_v14 = vor.u32 %v2075_v9, %v1927_v13  ;;  %v1858_v18 = vor.u32 %v2057_v15, %v1855_v16  ;;  %v2052_v9 = vld [vmem:[#allocation5 + $0x4] sm:$0xf0]  ;;  %v1925_v13 = vld [vmem:[#allocation5 + $0xc0] sm:$0xf]  ;;  %v2053_v15 = vld [vmem:[#allocation5 + $0x14] sm:$0xf] }
  0xd6   :  { %737 = vmatmul.bf16.vlgmr.msrb.gmra.mxu2 %v2528_v3  ;;  %786 = vmatmul.bf16.vlgmr.msrb.gmra.mxu3 %v2530_v10  ;;  %v395_v32 = vmax.f32 %v363_v52, 0.0  ;;  %v396_v36 = vmax.f32 %v364_v20, 0.0  ;;  %v194_v3 = vmul.f32 %v2414_v11, %v133_v38  ;;  %v195_v10 = vmul.f32 %v2416_v12, %v133_v38  ;;  %v2066_v52 = vld [vmem:[#allocation5 + $0x74] sm:$0xf0] }
  0xd7   :  { %v128_v31 = vpop.permute.xlu1 %127  ;;  %1223 = vmatpush.bf16.msra.mxu3 %v1930_v14  ;;  %v1886_v20 = vor.u32 %v2066_v52, %v1885_v19  ;;  %v2062_v38 = vld [vmem:[#allocation5 + $0x54] sm:$0xf0]  ;;  %v2076_v14 = vld [vmem:[#allocation5 + $0xc4] sm:$0xf0] }
  0xd8   :  { %v421_v39 = vpack.c.bf16 %v395_v32, %v393_v27  ;;  %v422_v40 = vpack.c.bf16 %v396_v36, %v394_v35  ;;  %v192_v41 = vmul.f32 %v2414_v11, %v128_v31  ;;  %v193_v42 = vmul.f32 %v2416_v12, %v128_v31  ;;  %v2064_v31 = vld [vmem:[#allocation5 + $0x64] sm:$0xf0]  ;;  %v2581_v36 = vld [vmem:[%s2825_s4] sm:$0x3] }
  0xd9   :  { %v232_v47 = vadd.f32 %v2424_v23, %v194_v3  ;;  %v233_v53 = vadd.f32 %v2426_v24, %v195_v10  ;;  %v333_v11 = vmul.f32 %v2428_v25, %v278_v43  ;;  %v334_v12 = vmul.f32 %v2430_v26, %v278_v43  ;;  %1073 = vmatpush.bf16.msrb.mxu0 %v1886_v20  ;;  %v1941_v3 = vld [vmem:[#allocation5 + $0xe0] sm:$0xf]  ;;  %v2080_v10 = vld [vmem:[#allocation5 + $0xe4] sm:$0xf0]  ;;  %v1847_v43 = vld [vmem:[#allocation5 + $0x28] sm:$0xf0] }
  0xda   :  { %v230_v55 = vadd.f32 %v2424_v23, %v192_v41  ;;  %v231_v56 = vadd.f32 %v2426_v24, %v193_v42  ;;  %v1922_v27 = vor.u32 %v2073_v50, %v1919_v21  ;;  %v1950_v32 = vor.u32 %v2082_v28, %v1949_v22  ;;  %v2055_v41 = vld [vmem:[#allocation5 + $0x24] sm:$0xf]  ;;  %v1839_v50 = vld [vmem:[#allocation5 + $0x18] sm:$0xf0] }
  0xdb   :  { %v1878_v35 = vor.u32 %v2064_v31, %v1877_v30  ;;  %v1942_v42 = vor.u32 %v2080_v10, %v1941_v3  ;;  %v1926_v20 = vor.u32 %v2076_v14, %v1925_v13  ;;  %v1842_v22 = vor.u32 %v2053_v15, %v1839_v50 }
  0xdc   :  { %v365_v1 = vadd.f32 %v333_v11, %v230_v55  ;;  %v366_v2 = vadd.f32 %v334_v12, %v231_v56  ;;  %1224 = vmatpush.bf16.msra.mxu3 %v1922_v27  ;;  %1122 = vmatpush.bf16.msrb.mxu1 %v1950_v32  ;;  %v2058_v11 = vld [vmem:[#allocation5 + $0x34] sm:$0xf0]  ;;  %v1903_v27 = vld [vmem:[#allocation5 + $0x98] sm:$0xf0]  ;;  %v2051_v32 = vld [vmem:[#allocation5 + $0x4] sm:$0xf] }
  0xdd   :  { %1074 = vmatpush.bf16.msrb.mxu0 %v1878_v35  ;;  %v1831_v35 = vld [vmem:[#allocation5 + $0x8] sm:$0xf0] }
  0xde   :  { %v397_v24 = vmax.f32 %v365_v1, 0.0  ;;  %v1846_v1 = vor.u32 %v2056_v48, %v1845_v60  ;;  %v1834_v3 = vor.u32 %v2051_v32, %v1831_v35  ;;  %v1901_v60 = vld [vmem:[#allocation5 + $0x90] sm:$0xf]  ;;  %v2070_v48 = vld [vmem:[#allocation5 + $0x94] sm:$0xf0] }
  0xdf   :  { %649 = vmatmul.bf16.gmra.mxu0 %v421_v39  ;;  %698 = vmatmul.bf16.gmra.mxu1 %v422_v40 }
  0xe0   :  { %v282_v46 = vpop.permute.xlu1 %281  ;;  %1123 = vmatpush.bf16.msrb.mxu1 %v1942_v42 }
  0xe1   :  { %v335_v54 = vmul.f32 %v2428_v25, %v282_v46  ;;  %v336_v17 = vmul.f32 %v2430_v26, %v282_v46  ;;  %v398_v25 = vmax.f32 %v366_v2, 0.0  ;;  %v1861_v46 = vld [vmem:[#allocation5 + $0x40] sm:$0xf] }
  0xe3   :  { %v367_v57 = vadd.f32 %v335_v54, %v232_v47  ;;  %v368_v58 = vadd.f32 %v336_v17, %v233_v53  ;;  %v2060_v47 = vld [vmem:[#allocation5 + $0x44] sm:$0xf0]  ;;  %v1850_v53 = vor.u32 %v2055_v41, %v1847_v43 }
  0xe4   :  { %v1862_v54 = vor.u32 %v2060_v47, %v1861_v46 }
  0xe5   :  { %v399_v23 = vmax.f32 %v367_v57, 0.0  ;;  %v400_v0 = vmax.f32 %v368_v58, 0.0  ;;  %v2071_v57 = vld [vmem:[#allocation5 + $0xa4] sm:$0xf]  ;;  %v1911_v58 = vld [vmem:[#allocation5 + $0xa8] sm:$0xf0] }
  0xe6   :  { %742 = vmatmul.bf16.gmra.mxu2 %v419_v62  ;;  %791 = vmatmul.bf16.gmra.mxu3 %v420_v29  ;;  %v2059_v62 = vld [vmem:[#allocation5 + $0x44] sm:$0xf]  ;;  %v1863_v29 = vld [vmem:[#allocation5 + $0x48] sm:$0xf0]  ;;  %v1914_v59 = vor.u32 %v2071_v57, %v1911_v58 }
  0xe7   :  { %v423_v5 = vpack.c.bf16 %v399_v23, %v397_v24  ;;  %v424_v26 = vpack.c.bf16 %v400_v0, %v398_v25  ;;  %v1866_v8 = vor.u32 %v2059_v62, %v1863_v29  ;;  %v1934_v23 = vor.u32 %v2078_v63, %v1933_v61  ;;  %v1837_v24 = vld [vmem:[#allocation5 + $0x10] sm:$0xf]  ;;  %v2054_v25 = vld [vmem:[#allocation5 + $0x14] sm:$0xf0]  ;;  %v1895_v57 = vld [vmem:[#allocation5 + $0x88] sm:$0xf0] }
  0xe8   :  { %1225 = vmatpush.bf16.msra.mxu3 %v1914_v59  ;;  %v1902_v63 = vor.u32 %v2070_v48, %v1901_v60 }
  0xe9   :  { %1174 = vmatpush.bf16.msra.mxu2 %v1866_v8  ;;  %1124 = vmatpush.bf16.msrb.mxu1 %v1934_v23  ;;  %v1829_v8 = vld [vmem:[#allocation5] sm:$0xf] }
  0xea   :  { %v1830_v16 = vor.u32 %v2052_v9, %v1829_v8 }
  0xed   :  { %1175 = vmatpush.bf16.msra.mxu2 %v1858_v18  ;;  %1125 = vmatpush.bf16.msrb.mxu1 %v1926_v20 }
  0xef   :  { %654 = vmatmul.bf16.gmra.mxu0 %v423_v5  ;;  %703 = vmatmul.bf16.gmra.mxu1 %v424_v26 }
  0xf1   :  { %1176 = vmatpush.bf16.msra.mxu2 %v1850_v53 }
  0xf5   :  { %1177 = vmatpush.bf16.msra.mxu2 %v1842_v22 }
  0xf6   :  { %747 = vmatmul.bf16.gmra.mxu2 %v421_v39  ;;  %796 = vmatmul.bf16.gmra.mxu3 %v422_v40  ;;  %v1870_v39 = vor.u32 %v2062_v38, %v1869_v37  ;;  %v2584_v40 = vperm.slane %v2581_v36, 0  ;;  %v1917_v38 = vld [vmem:[#allocation5 + $0xb0] sm:$0xf] }
  0xf8   :  { %1075 = vmatpush.bf16.msrb.mxu0 %v1870_v39  ;;  %v2074_v39 = vld [vmem:[#allocation5 + $0xb4] sm:$0xf0] }
  0xf9   :  { %v1918_v10 = vor.u32 %v2074_v39, %v1917_v38  ;;  %1178 = vmatpush.bf16.msra.mxu2 %v1834_v3 }
  0xfb   :  { %1126 = vmatpush.bf16.msrb.mxu1 %v1918_v10 }
  0xfc   :  { %1076 = vmatpush.bf16.msrb.mxu0 %v1862_v54 }
 0x106   :  { %752 = vmatmul.bf16.gmra.mxu2 %v423_v5  ;;  %801 = vmatmul.bf16.gmra.mxu3 %v424_v26  ;;  %v1838_v26 = vor.u32 %v2054_v25, %v1837_v24  ;;  %v1893_v24 = vld [vmem:[#allocation5 + $0x80] sm:$0xf]  ;;  %v2068_v25 = vld [vmem:[#allocation5 + $0x84] sm:$0xf0] }
 0x116   :  { %757 = vmatmul.bf16.gmra.mxu2 %v2454_v6  ;;  %806 = vmatmul.bf16.gmra.mxu3 %v2456_v7  ;;  %v1853_v6 = vld [vmem:[#allocation5 + $0x30] sm:$0xf] }
 0x117   :  { %v1854_v12 = vor.u32 %v2058_v11, %v1853_v6 }
 0x119   :  { %v660_v17 = vpop.f32.mrf.mxu2  ;;  %v709_v55 = vpop.f32.mrf.mxu3  ;;  %1077 = vmatpush.bf16.msrb.mxu0 %v1854_v12  ;;  %v2067_v12 = vld [vmem:[#allocation5 + $0x84] sm:$0xf] }
 0x11a   :  { %v661_v56 = vadd.f32 %v660_v17, %v2584_v40  ;;  %v1909_v17 = vld [vmem:[#allocation5 + $0xa0] sm:$0xf]  ;;  %v1898_v58 = vor.u32 %v2067_v12, %v1895_v57 }
 0x11c   :  { %v710_v7 = vadd.f32 %v709_v55, %v661_v56  ;;  %v2072_v55 = vld [vmem:[#allocation5 + $0xa4] sm:$0xf0] }
 0x11d   :  { %1078 = vmatpush.bf16.msrb.mxu0 %v1846_v1  ;;  %v1910_v11 = vor.u32 %v2072_v55, %v1909_v17  ;;  %v2098_v17 = vld [vmem:[%s2828_s7 + $0x78] sm:$0xff] }
 0x11e   :  { %v843_v62 = vmax.f32 %v710_v7, 0.0 }
 0x11f   :  { %1127 = vmatpush.bf16.msrb.mxu1 %v1910_v11 }
 0x121   :  { %v662_v2 = vpop.f32.mrf.mxu2  ;;  %v711_v4 = vpop.f32.mrf.mxu3  ;;  %1079 = vmatpush.bf16.msrb.mxu0 %v1838_v26 }
 0x122   :  { %v663_v0 = vadd.f32 %v662_v2, %v2584_v40 }
 0x123   :  { %1128 = vmatpush.bf16.msrb.mxu1 %v1902_v63 }
 0x124   :  { %v712_v5 = vadd.f32 %v711_v4, %v663_v0 }
 0x125   :  { %1080 = vmatpush.bf16.msrb.mxu0 %v1830_v16 }
 0x126   :  { %v845_v29 = vmax.f32 %v712_v5, 0.0  ;;  %762 = vmatmul.bf16.gmra.mxu2 %v2472_v49  ;;  %811 = vmatmul.bf16.gmra.mxu3 %v2474_v51  ;;  %v2069_v51 = vld [vmem:[#allocation5 + $0x94] sm:$0xf] }
 0x127   :  { %v1906_v28 = vor.u32 %v2069_v51, %v1903_v27 }
 0x128   :  { %v2592_v18 = vpack.c.bf16 %v845_v29, %v843_v62  ;;  %v1894_v29 = vor.u32 %v2068_v25, %v1893_v24  ;;  %v2089_v25 = vld [vmem:[%s2828_s7 + $0x30] sm:$0xff] }
 0x129   :  { %v665_v19 = vpop.f32.mrf.mxu2  ;;  %v714_v52 = vpop.f32.mrf.mxu3  ;;  %1226 = vmatpush.bf16.msra.mxu3 %v1906_v28 }
 0x12a   :  { %v666_v21 = vadd.f32 %v665_v19, %v2584_v40  ;;  %1129 = vmatpush.bf16.msrb.mxu1 %v1894_v29 }
 0x12c   :  { %v715_v49 = vadd.f32 %v714_v52, %v666_v21 }
 0x12d   :  { %1227 = vmatpush.bf16.msra.mxu3 %v1898_v58 }
 0x12e   :  { %v847_v42 = vmax.f32 %v715_v49, 0.0  ;;  %1498 = vmatpush.bf16.msra.mxu1 %v2098_v17  ;;  %v2095_v17 = vld [vmem:[%s2828_s7 + $0x60] sm:$0xff] }
 0x131   :  { %v667_v30 = vpop.f32.mrf.mxu2  ;;  %v716_v31 = vpop.f32.mrf.mxu3 }
 0x132   :  { %v668_v37 = vadd.f32 %v667_v30, %v2584_v40 }
 0x134   :  { %v717_v41 = vadd.f32 %v716_v31, %v668_v37 }
 0x136   :  { %v849_v43 = vmax.f32 %v717_v41, 0.0  ;;  %767 = vmatmul.bf16.gmra.mxu2 %v2508_v44  ;;  %816 = vmatmul.bf16.gmra.mxu3 %v2510_v45  ;;  %v2615_v41 = vperm.slane %v2581_v36, 1 }
 0x138   :  { %v2598_v46 = vpack.c.bf16 %v849_v43, %v847_v42 }
 0x139   :  { %v670_v47 = vpop.f32.mrf.mxu2  ;;  %v719_v53 = vpop.f32.mrf.mxu3 }
 0x13a   :  { %v671_v54 = vadd.f32 %v670_v47, %v2584_v40  ;;  %v640_v56 = vpop.f32.mrf.mxu0  ;;  %v689_v6 = vpop.f32.mrf.mxu1 }
 0x13b   :  { %v641_v44 = vadd.f32 %v640_v56, %v2584_v40 }
 0x13c   :  { %v720_v7 = vadd.f32 %v719_v53, %v671_v54  ;;  %v2090_v54 = vld [vmem:[%s2828_s7 + $0x38] sm:$0xff] }
 0x13d   :  { %v690_v2 = vadd.f32 %v689_v6, %v641_v44  ;;  %1449 = vmatpush.bf16.msra.mxu0 %v2090_v54  ;;  %v2087_v54 = vld [vmem:[%s2828_s7 + $0x20] sm:$0xff] }
 0x13e   :  { %v851_v5 = vmax.f32 %v720_v7, 0.0 }
 0x13f   :  { %v827_v8 = vmax.f32 %v690_v2, 0.0 }
 0x141   :  { %v672_v59 = vpop.f32.mrf.mxu2  ;;  %v721_v45 = vpop.f32.mrf.mxu3  ;;  %1450 = vmatpush.bf16.msra.mxu0 %v2089_v25 }
 0x142   :  { %v673_v61 = vadd.f32 %v672_v59, %v2584_v40  ;;  %v642_v1 = vpop.f32.mrf.mxu0  ;;  %v691_v0 = vpop.f32.mrf.mxu1 }
 0x143   :  { %v643_v23 = vadd.f32 %v642_v1, %v2584_v40 }
 0x144   :  { %v722_v4 = vadd.f32 %v721_v45, %v673_v61 }
 0x145   :  { %v692_v62 = vadd.f32 %v691_v0, %v643_v23 }
 0x146   :  { %v853_v26 = vmax.f32 %v722_v4, 0.0  ;;  %772 = vmatmul.bf16.gmra.mxu2 %v2542_v33  ;;  %821 = vmatmul.bf16.gmra.mxu3 %v2544_v34 }
 0x147   :  { %v829_v9 = vmax.f32 %v692_v62, 0.0 }
 0x148   :  { %v2606_v13 = vpack.c.bf16 %v853_v26, %v851_v5  ;;  %v2097_v5 = vld [vmem:[%s2828_s7 + $0x70] sm:$0xff] }
 0x149   :  { %v675_v14 = vpop.f32.mrf.mxu2  ;;  %v724_v15 = vpop.f32.mrf.mxu3  ;;  %v859_v19 = vpack.c.bf16 %v829_v9, %v827_v8  ;;  %1499 = vmatpush.bf16.msra.mxu1 %v2097_v5  ;;  %v2085_v5 = vld [vmem:[%s2828_s7 + $0x10] sm:$0xff] }
 0x14a   :  { %v676_v16 = vadd.f32 %v675_v14, %v2584_v40 }
 0x14b   :  { %1081 = vmatmul.bf16.vlgmr.msrb.gmra.mxu0 %v859_v19 }
 0x14c   :  { %v725_v52 = vadd.f32 %v724_v15, %v676_v16  ;;  %v645_v20 = vpop.f32.mrf.mxu0  ;;  %v694_v50 = vpop.f32.mrf.mxu1 }
 0x14d   :  { %v646_v21 = vadd.f32 %v645_v20, %v2584_v40 }
 0x14e   :  { %v855_v30 = vmax.f32 %v725_v52, 0.0 }
 0x14f   :  { %v695_v49 = vadd.f32 %v694_v50, %v646_v21 }
 0x151   :  { %v677_v33 = vpop.f32.mrf.mxu2  ;;  %v726_v22 = vpop.f32.mrf.mxu3  ;;  %v831_v35 = vmax.f32 %v695_v49, 0.0 }
 0x152   :  { %v678_v34 = vadd.f32 %v677_v33, %v2584_v40 }
 0x154   :  { %v727_v51 = vadd.f32 %v726_v22, %v678_v34  ;;  %v647_v27 = vpop.f32.mrf.mxu0  ;;  %v696_v28 = vpop.f32.mrf.mxu1 }
 0x155   :  { %v648_v32 = vadd.f32 %v647_v27, %v2584_v40 }
 0x156   :  { %v857_v31 = vmax.f32 %v727_v51, 0.0  ;;  %1179 = vmatmul.bf16.vlgmr.msra.gmra.mxu2 %v859_v19 }
 0x157   :  { %v697_v37 = vadd.f32 %v696_v28, %v648_v32 }
 0x158   :  { %v2612_v38 = vpack.c.bf16 %v857_v31, %v855_v30  ;;  %v2088_v30 = vld [vmem:[%s2828_s7 + $0x28] sm:$0xff] }
 0x159   :  { %v738_v39 = vpop.f32.mrf.mxu2  ;;  %v787_v3 = vpop.f32.mrf.mxu3  ;;  %v833_v10 = vmax.f32 %v697_v37, 0.0  ;;  %1451 = vmatpush.bf16.msra.mxu0 %v2088_v30 }
 0x15a   :  { %v739_v53 = vadd.f32 %v738_v39, %v2615_v41 }
 0x15b   :  { %v861_v42 = vpack.c.bf16 %v833_v10, %v831_v35 }
 0x15c   :  { %v650_v43 = vpop.f32.mrf.mxu0  ;;  %v699_v47 = vpop.f32.mrf.mxu1  ;;  %v788_v36 = vadd.f32 %v787_v3, %v739_v53 }
 0x15d   :  { %1086 = vmatmul.bf16.gmra.mxu0 %v861_v42  ;;  %v651_v6 = vadd.f32 %v650_v43, %v2584_v40 }
 0x15e   :  { %v828_v58 = vmax.f32 %v788_v36, 0.0  ;;  %1452 = vmatpush.bf16.msra.mxu0 %v2087_v54 }
 0x15f   :  { %v700_v44 = vadd.f32 %v699_v47, %v651_v6 }
 0x161   :  { %v740_v55 = vpop.f32.mrf.mxu2  ;;  %v789_v56 = vpop.f32.mrf.mxu3  ;;  %v835_v1 = vmax.f32 %v700_v44, 0.0 }
 0x162   :  { %v741_v11 = vadd.f32 %v740_v55, %v2615_v41 }
 0x164   :  { %v790_v7 = vadd.f32 %v789_v56, %v741_v11  ;;  %v652_v12 = vpop.f32.mrf.mxu0  ;;  %v701_v57 = vpop.f32.mrf.mxu1 }
 0x165   :  { %v653_v45 = vadd.f32 %v652_v12, %v2584_v40 }
 0x166   :  { %v830_v59 = vmax.f32 %v790_v7, 0.0  ;;  %1184 = vmatmul.bf16.gmra.mxu2 %v861_v42 }
 0x167   :  { %v702_v60 = vadd.f32 %v701_v57, %v653_v45  ;;  %v2086_v45 = vld [vmem:[%s2828_s7 + $0x18] sm:$0xff] }
 0x168   :  { %v860_v48 = vpack.c.bf16 %v830_v59, %v828_v58  ;;  %1453 = vmatpush.bf16.msra.mxu0 %v2086_v45 }
 0x169   :  { %v743_v61 = vpop.f32.mrf.mxu2  ;;  %v792_v63 = vpop.f32.mrf.mxu3  ;;  %v837_v2 = vmax.f32 %v702_v60, 0.0  ;;  %v2094_v60 = vld [vmem:[%s2828_s7 + $0x58] sm:$0xff] }
 0x16a   :  { %1130 = vmatmul.bf16.vlgmr.msrb.gmra.mxu1 %v860_v48  ;;  %1228 = vmatmul.bf16.vlgmr.msra.gmra.mxu3 %v860_v48  ;;  %v744_v24 = vadd.f32 %v743_v61, %v2615_v41 }
 0x16b   :  { %v863_v4 = vpack.c.bf16 %v837_v2, %v835_v1 }
 0x16c   :  { %v655_v23 = vpop.f32.mrf.mxu0  ;;  %v704_v0 = vpop.f32.mrf.mxu1  ;;  %v793_v29 = vadd.f32 %v792_v63, %v744_v24  ;;  %1454 = vmatpush.bf16.msra.mxu0 %v2085_v5 }
 0x16d   :  { %1091 = vmatmul.bf16.gmra.mxu0 %v863_v4  ;;  %v656_v8 = vadd.f32 %v655_v23, %v2584_v40 }
 0x16e   :  { %v832_v16 = vmax.f32 %v793_v29, 0.0 }
 0x16f   :  { %v705_v19 = vadd.f32 %v704_v0, %v656_v8 }
 0x171   :  { %v745_v26 = vpop.f32.mrf.mxu2  ;;  %v794_v62 = vpop.f32.mrf.mxu3  ;;  %v839_v49 = vmax.f32 %v705_v19, 0.0 }
 0x172   :  { %v746_v9 = vadd.f32 %v745_v26, %v2615_v41  ;;  %v2093_v26 = vld [vmem:[%s2828_s7 + $0x50] sm:$0xff] }
 0x174   :  { %v795_v14 = vadd.f32 %v794_v62, %v746_v9  ;;  %v657_v15 = vpop.f32.mrf.mxu0  ;;  %v706_v50 = vpop.f32.mrf.mxu1 }
 0x175   :  { %v658_v20 = vadd.f32 %v657_v15, %v2584_v40  ;;  %v2096_v40 = vld [vmem:[%s2828_s7 + $0x68] sm:$0xff] }
 0x176   :  { %v834_v52 = vmax.f32 %v795_v14, 0.0  ;;  %1189 = vmatmul.bf16.gmra.mxu2 %v863_v4  ;;  %1500 = vmatpush.bf16.msra.mxu1 %v2096_v40 }
 0x177   :  { %v707_v21 = vadd.f32 %v706_v50, %v658_v20  ;;  %v2084_v20 = vld [vmem:[%s2828_s7 + $0x8] sm:$0xff] }
 0x178   :  { %v862_v33 = vpack.c.bf16 %v834_v52, %v832_v16  ;;  %1455 = vmatpush.bf16.msra.mxu0 %v2084_v20  ;;  %v2092_v50 = vld [vmem:[%s2828_s7 + $0x48] sm:$0xff] }
 0x179   :  { %v748_v22 = vpop.f32.mrf.mxu2  ;;  %v797_v34 = vpop.f32.mrf.mxu3  ;;  %v841_v51 = vmax.f32 %v707_v21, 0.0 }
 0x17a   :  { %1135 = vmatmul.bf16.gmra.mxu1 %v862_v33  ;;  %1233 = vmatmul.bf16.gmra.mxu3 %v862_v33  ;;  %v749_v28 = vadd.f32 %v748_v22, %v2615_v41 }
 0x17b   :  { %v865_v27 = vpack.c.bf16 %v841_v51, %v839_v49  ;;  %1501 = vmatpush.bf16.msra.mxu1 %v2095_v17 }
 0x17c   :  { %v798_v35 = vadd.f32 %v797_v34, %v749_v28 }
 0x17d   :  { %1096 = vmatmul.bf16.gmra.mxu0 %v865_v27 }
 0x17e   :  { %v836_v3 = vmax.f32 %v798_v35, 0.0  ;;  %v2091_v35 = vld [vmem:[%s2828_s7 + $0x40] sm:$0xff] }
 0x17f   :  { %1502 = vmatpush.bf16.msra.mxu1 %v2094_v60 }
 0x181   :  { %v750_v31 = vpop.f32.mrf.mxu2  ;;  %v799_v32 = vpop.f32.mrf.mxu3 }
 0x182   :  { %v751_v37 = vadd.f32 %v750_v31, %v2615_v41 }
 0x183   :  { %1503 = vmatpush.bf16.msra.mxu1 %v2093_v26 }
 0x184   :  { %v800_v39 = vadd.f32 %v799_v32, %v751_v37  ;;  %v2083_v32 = vld [vmem:[%s2828_s7] sm:$0xff] }
 0x185   :  { %1456 = vmatpush.bf16.msra.mxu0 %v2083_v32 }
 0x186   :  { %v838_v10 = vmax.f32 %v800_v39, 0.0  ;;  %1194 = vmatmul.bf16.gmra.mxu2 %v865_v27 }
 0x187   :  { %1504 = vmatpush.bf16.msra.mxu1 %v2092_v50 }
 0x188   :  { %v864_v42 = vpack.c.bf16 %v838_v10, %v836_v3 }
 0x189   :  { %v753_v43 = vpop.f32.mrf.mxu2  ;;  %v802_v47 = vpop.f32.mrf.mxu3 }
 0x18a   :  { %1140 = vmatmul.bf16.gmra.mxu1 %v864_v42  ;;  %1238 = vmatmul.bf16.gmra.mxu3 %v864_v42  ;;  %v754_v53 = vadd.f32 %v753_v43, %v2615_v41 }
 0x18b   :  { %1505 = vmatpush.bf16.msra.mxu1 %v2091_v35 }
 0x18c   :  { %v803_v36 = vadd.f32 %v802_v47, %v754_v53 }
 0x18d   :  { %1101 = vmatmul.bf16.gmra.mxu0 %v2592_v18 }
 0x18e   :  { %v840_v7 = vmax.f32 %v803_v36, 0.0 }
 0x191   :  { %v755_v55 = vpop.f32.mrf.mxu2  ;;  %v804_v56 = vpop.f32.mrf.mxu3 }
 0x192   :  { %v756_v6 = vadd.f32 %v755_v55, %v2615_v41 }
 0x194   :  { %v805_v11 = vadd.f32 %v804_v56, %v756_v6  ;;  %v907_v6 = vld [vmem:[#allocation7] sm:$0x3] }
 0x196   :  { %v842_v12 = vmax.f32 %v805_v11, 0.0  ;;  %1199 = vmatmul.bf16.gmra.mxu2 %v2592_v18 }
 0x198   :  { %v866_v57 = vpack.c.bf16 %v842_v12, %v840_v7  ;;  %v2693_v7 = vperm.slane %v907_v6, 0 }
 0x199   :  { %v758_v58 = vpop.f32.mrf.mxu2  ;;  %v807_v44 = vpop.f32.mrf.mxu3 }
 0x19a   :  { %1145 = vmatmul.bf16.gmra.mxu1 %v866_v57  ;;  %1243 = vmatmul.bf16.gmra.mxu3 %v866_v57  ;;  %v759_v59 = vadd.f32 %v758_v58, %v2615_v41 }
 0x19c   :  { %v808_v61 = vadd.f32 %v807_v44, %v759_v59  ;;  %v2697_v59 = vperm.slane %v907_v6, 1 }
 0x19d   :  { %1106 = vmatmul.bf16.gmra.mxu0 %v2598_v46 }
 0x19e   :  { %v844_v2 = vmax.f32 %v808_v61, 0.0 }
 0x1a1   :  { %v760_v18 = vpop.f32.mrf.mxu2  ;;  %v809_v48 = vpop.f32.mrf.mxu3 }
 0x1a2   :  { %v761_v63 = vadd.f32 %v760_v18, %v2615_v41 }
 0x1a4   :  { %v810_v1 = vadd.f32 %v809_v48, %v761_v63 }
 0x1a6   :  { %v846_v4 = vmax.f32 %v810_v1, 0.0  ;;  %1204 = vmatmul.bf16.gmra.mxu2 %v2598_v46 }
 0x1a8   :  { %v868_v23 = vpack.c.bf16 %v846_v4, %v844_v2 }
 0x1a9   :  { %v763_v0 = vpop.f32.mrf.mxu2  ;;  %v812_v24 = vpop.f32.mrf.mxu3 }
 0x1aa   :  { %1150 = vmatmul.bf16.gmra.mxu1 %v868_v23  ;;  %1248 = vmatmul.bf16.gmra.mxu3 %v868_v23  ;;  %v764_v25 = vadd.f32 %v763_v0, %v2615_v41 }
 0x1ac   :  { %v813_v29 = vadd.f32 %v812_v24, %v764_v25 }
 0x1ad   :  { %1111 = vmatmul.bf16.gmra.mxu0 %v2606_v13 }
 0x1ae   :  { %v848_v14 = vmax.f32 %v813_v29, 0.0 }
 0x1b1   :  { %v765_v46 = vpop.f32.mrf.mxu2  ;;  %v814_v62 = vpop.f32.mrf.mxu3 }
 0x1b2   :  { %v766_v8 = vadd.f32 %v765_v46, %v2615_v41 }
 0x1b4   :  { %v815_v9 = vadd.f32 %v814_v62, %v766_v8 }
 0x1b6   :  { %v850_v15 = vmax.f32 %v815_v9, 0.0  ;;  %1209 = vmatmul.bf16.gmra.mxu2 %v2606_v13 }
 0x1b8   :  { %v870_v16 = vpack.c.bf16 %v850_v15, %v848_v14 }
 0x1b9   :  { %v768_v19 = vpop.f32.mrf.mxu2  ;;  %v817_v52 = vpop.f32.mrf.mxu3 }
 0x1ba   :  { %1155 = vmatmul.bf16.gmra.mxu1 %v870_v16  ;;  %1253 = vmatmul.bf16.gmra.mxu3 %v870_v16  ;;  %v769_v21 = vadd.f32 %v768_v19, %v2615_v41 }
 0x1bc   :  { %v818_v22 = vadd.f32 %v817_v52, %v769_v21 }
 0x1bd   :  { %1116 = vmatmul.bf16.gmra.mxu0 %v2612_v38 }
 0x1be   :  { %v852_v51 = vmax.f32 %v818_v22, 0.0 }
 0x1c1   :  { %v770_v13 = vpop.f32.mrf.mxu2  ;;  %v819_v33 = vpop.f32.mrf.mxu3 }
 0x1c2   :  { %v771_v34 = vadd.f32 %v770_v13, %v2615_v41 }
 0x1c4   :  { %v820_v49 = vadd.f32 %v819_v33, %v771_v34 }
 0x1c6   :  { %v854_v27 = vmax.f32 %v820_v49, 0.0  ;;  %1214 = vmatmul.bf16.gmra.mxu2 %v2612_v38 }
 0x1c8   :  { %v872_v28 = vpack.c.bf16 %v854_v27, %v852_v51  ;;  %v1082_v31 = vpop.f32.mrf.mxu0 }
 0x1c9   :  { %v773_v30 = vpop.f32.mrf.mxu2  ;;  %v822_v40 = vpop.f32.mrf.mxu3  ;;  %v1083_v57 = vadd.f32 %v1082_v31, %v2693_v7 }
 0x1ca   :  { %1160 = vmatmul.bf16.gmra.mxu1 %v872_v28  ;;  %1258 = vmatmul.bf16.gmra.mxu3 %v872_v28  ;;  %v774_v37 = vadd.f32 %v773_v30, %v2615_v41 }
 0x1cc   :  { %v823_v38 = vadd.f32 %v822_v40, %v774_v37 }
 0x1ce   :  { %v856_v47 = vmax.f32 %v823_v38, 0.0 }
 0x1d0   :  { %v1084_v42 = vpop.f32.mrf.mxu0 }
 0x1d1   :  { %v775_v39 = vpop.f32.mrf.mxu2  ;;  %v824_v10 = vpop.f32.mrf.mxu3  ;;  %v1085_v44 = vadd.f32 %v1084_v42, %v2693_v7 }
 0x1d2   :  { %v776_v3 = vadd.f32 %v775_v39, %v2615_v41 }
 0x1d4   :  { %v825_v43 = vadd.f32 %v824_v10, %v776_v3 }
 0x1d6   :  { %v858_v53 = vmax.f32 %v825_v43, 0.0 }
 0x1d8   :  { %v874_v54 = vpack.c.bf16 %v858_v53, %v856_v47 }
 0x1d9   :  { %v1180_v17 = vpop.f32.mrf.mxu2 }
 0x1da   :  { %1165 = vmatmul.bf16.gmra.mxu1 %v874_v54  ;;  %1263 = vmatmul.bf16.gmra.mxu3 %v874_v54  ;;  %v1087_v55 = vpop.f32.mrf.mxu0  ;;  %v1181_v61 = vadd.f32 %v1180_v17, %v2697_v59 }
 0x1db   :  { %v1088_v8 = vadd.f32 %v1087_v55, %v2693_v7 }
 0x1e1   :  { %v1182_v56 = vpop.f32.mrf.mxu2 }
 0x1e2   :  { %v1089_v36 = vpop.f32.mrf.mxu0  ;;  %v1183_v2 = vadd.f32 %v1182_v56, %v2697_v59 }
 0x1e3   :  { %v1090_v14 = vadd.f32 %v1089_v36, %v2693_v7 }
 0x1e7   :  { %v1131_v11 = vpop.f32.mrf.mxu1 }
 0x1e8   :  { %v1132_v45 = vadd.f32 %v1131_v11, %v1083_v57 }
 0x1e9   :  { %v1185_v12 = vpop.f32.mrf.mxu2 }
 0x1ea   :  { %v1092_v41 = vpop.f32.mrf.mxu0  ;;  %v1269_v63 = vmax.f32 %v1132_v45, 0.0  ;;  %v1186_v50 = vadd.f32 %v1185_v12, %v2697_v59 }
 0x1eb   :  { %v1093_v35 = vadd.f32 %v1092_v41, %v2693_v7 }
 0x1ed   :  { %v1229_v58 = vpop.f32.mrf.mxu3 }
 0x1ee   :  { %v1230_v4 = vadd.f32 %v1229_v58, %v1181_v61 }
 0x1ef   :  { %v1133_v60 = vpop.f32.mrf.mxu1 }
 0x1f0   :  { %v1134_v18 = vadd.f32 %v1133_v60, %v1085_v44  ;;  %v1270_v26 = vmax.f32 %v1230_v4, 0.0 }
 0x1f1   :  { %v1187_v48 = vpop.f32.mrf.mxu2 }
 0x1f2   :  { %v1271_v1 = vmax.f32 %v1134_v18, 0.0  ;;  %v1094_v25 = vpop.f32.mrf.mxu0  ;;  %v1188_v33 = vadd.f32 %v1187_v48, %v2697_v59 }
 0x1f3   :  { %v1095_v39 = vadd.f32 %v1094_v25, %v2693_v7 }
 0x1f4   :  { %v1301_v23 = vpack.c.bf16 %v1271_v1, %v1269_v63 }
 0x1f5   :  { %v1231_v0 = vpop.f32.mrf.mxu3 }
 0x1f6   :  { %v1232_v24 = vadd.f32 %v1231_v0, %v1183_v2  ;;  %1457 = vmatmul.bf16.vlgmr.msra.gmra.mxu0 %v1301_v23 }
 0x1f7   :  { %v1136_v5 = vpop.f32.mrf.mxu1 }
 0x1f8   :  { %v1272_v46 = vmax.f32 %v1232_v24, 0.0  ;;  %v1137_v15 = vadd.f32 %v1136_v5, %v1088_v8 }
 0x1f9   :  { %v1190_v62 = vpop.f32.mrf.mxu2 }
 0x1fa   :  { %v1302_v29 = vpack.c.bf16 %v1272_v46, %v1270_v26  ;;  %v1097_v52 = vpop.f32.mrf.mxu0  ;;  %v1273_v21 = vmax.f32 %v1137_v15, 0.0  ;;  %v1191_v43 = vadd.f32 %v1190_v62, %v2697_v59 }
 0x1fb   :  { %v1098_v44 = vadd.f32 %v1097_v52, %v2693_v7 }
 0x1fc   :  { %1506 = vmatmul.bf16.vlgmr.msra.gmra.mxu1 %v1302_v29 }
 0x1fd   :  { %v1234_v9 = vpop.f32.mrf.mxu3 }
 0x1fe   :  { %v1235_v22 = vadd.f32 %v1234_v9, %v1186_v50 }
 0x1ff   :  { %v1138_v16 = vpop.f32.mrf.mxu1 }
 0x200   :  { %v1139_v19 = vadd.f32 %v1138_v16, %v1090_v14  ;;  %v1274_v28 = vmax.f32 %v1235_v22, 0.0 }
 0x201   :  { %v1192_v20 = vpop.f32.mrf.mxu2 }
 0x202   :  { %v1275_v13 = vmax.f32 %v1139_v19, 0.0  ;;  %v1099_v32 = vpop.f32.mrf.mxu0  ;;  %v1193_v54 = vadd.f32 %v1192_v20, %v2697_v59 }
 0x203   :  { %v1100_v60 = vadd.f32 %v1099_v32, %v2693_v7 }
 0x204   :  { %v1303_v34 = vpack.c.bf16 %v1275_v13, %v1273_v21 }
 0x205   :  { %v1236_v49 = vpop.f32.mrf.mxu3 }
 0x206   :  { %v1237_v51 = vadd.f32 %v1236_v49, %v1188_v33  ;;  %1462 = vmatmul.bf16.gmra.mxu0 %v1303_v34 }
 0x207   :  { %v1141_v27 = vpop.f32.mrf.mxu1 }
 0x208   :  { %v1276_v30 = vmax.f32 %v1237_v51, 0.0  ;;  %v1142_v38 = vadd.f32 %v1141_v27, %v1093_v35 }
 0x209   :  { %v1195_v40 = vpop.f32.mrf.mxu2 }
 0x20a   :  { %v1304_v31 = vpack.c.bf16 %v1276_v30, %v1274_v28  ;;  %v1277_v47 = vmax.f32 %v1142_v38, 0.0  ;;  %v1102_v56 = vpop.f32.mrf.mxu0  ;;  %v1196_v1 = vadd.f32 %v1195_v40, %v2697_v59 }
 0x20b   :  { %v1103_v14 = vadd.f32 %v1102_v56, %v2693_v7 }
 0x20c   :  { %1511 = vmatmul.bf16.gmra.mxu1 %v1304_v31 }
 0x20d   :  { %v1239_v37 = vpop.f32.mrf.mxu3 }
 0x20e   :  { %v1240_v17 = vadd.f32 %v1239_v37, %v1191_v43 }
 0x20f   :  { %v1143_v3 = vpop.f32.mrf.mxu1 }
 0x210   :  { %v1144_v10 = vadd.f32 %v1143_v3, %v1095_v39  ;;  %v1278_v12 = vmax.f32 %v1240_v17, 0.0 }
 0x211   :  { %v1197_v42 = vpop.f32.mrf.mxu2 }
 0x212   :  { %v1279_v53 = vmax.f32 %v1144_v10, 0.0  ;;  %v1104_v48 = vpop.f32.mrf.mxu0  ;;  %v1198_v23 = vadd.f32 %v1197_v42, %v2697_v59 }
 0x213   :  { %v1105_v16 = vadd.f32 %v1104_v48, %v2693_v7 }
 0x214   :  { %v1305_v55 = vpack.c.bf16 %v1279_v53, %v1277_v47 }
 0x215   :  { %v1241_v36 = vpop.f32.mrf.mxu3 }
 0x216   :  { %v1242_v6 = vadd.f32 %v1241_v36, %v1193_v54  ;;  %1467 = vmatmul.bf16.gmra.mxu0 %v1305_v55 }
 0x217   :  { %v1146_v11 = vpop.f32.mrf.mxu1 }
 0x218   :  { %v1280_v57 = vmax.f32 %v1242_v6, 0.0  ;;  %v1147_v18 = vadd.f32 %v1146_v11, %v1098_v44 }
 0x219   :  { %v1200_v58 = vpop.f32.mrf.mxu2 }
 0x21a   :  { %v1306_v41 = vpack.c.bf16 %v1280_v57, %v1278_v12  ;;  %v1281_v2 = vmax.f32 %v1147_v18, 0.0  ;;  %v1107_v8 = vpop.f32.mrf.mxu0  ;;  %v1201_v21 = vadd.f32 %v1200_v58, %v2697_v59 }
 0x21b   :  { %v1108_v37 = vadd.f32 %v1107_v8, %v2693_v7 }
 0x21c   :  { %1516 = vmatmul.bf16.gmra.mxu1 %v1306_v41 }
 0x21d   :  { %v1244_v45 = vpop.f32.mrf.mxu3 }
 0x21e   :  { %v1245_v0 = vadd.f32 %v1244_v45, %v1196_v1 }
 0x21f   :  { %v1148_v61 = vpop.f32.mrf.mxu1 }
 0x220   :  { %v1149_v63 = vadd.f32 %v1148_v61, %v1100_v60  ;;  %v1282_v62 = vmax.f32 %v1245_v0, 0.0 }
 0x221   :  { %v1202_v25 = vpop.f32.mrf.mxu2 }
 0x222   :  { %v1283_v4 = vmax.f32 %v1149_v63, 0.0  ;;  %v1109_v22 = vpop.f32.mrf.mxu0  ;;  %v1203_v34 = vadd.f32 %v1202_v25, %v2697_v59 }
 0x223   :  { %v1110_v3 = vadd.f32 %v1109_v22, %v2693_v7 }
 0x224   :  { %v1307_v24 = vpack.c.bf16 %v1283_v4, %v1281_v2 }
 0x225   :  { %v1246_v5 = vpop.f32.mrf.mxu3 }
 0x226   :  { %v1247_v26 = vadd.f32 %v1246_v5, %v1198_v23  ;;  %1472 = vmatmul.bf16.gmra.mxu0 %v1307_v24 }
 0x227   :  { %v1151_v46 = vpop.f32.mrf.mxu1 }
 0x228   :  { %v1284_v29 = vmax.f32 %v1247_v26, 0.0  ;;  %v1152_v19 = vadd.f32 %v1151_v46, %v1103_v14 }
 0x229   :  { %v1205_v52 = vpop.f32.mrf.mxu2 }
 0x22a   :  { %v1308_v9 = vpack.c.bf16 %v1284_v29, %v1282_v62  ;;  %v1285_v13 = vmax.f32 %v1152_v19, 0.0  ;;  %v1112_v39 = vpop.f32.mrf.mxu0  ;;  %v1206_v47 = vadd.f32 %v1205_v52, %v2697_v59 }
 0x22b   :  { %v1113_v45 = vadd.f32 %v1112_v39, %v2693_v7 }
 0x22c   :  { %1521 = vmatmul.bf16.gmra.mxu1 %v1308_v9 }
 0x22d   :  { %v1249_v15 = vpop.f32.mrf.mxu3 }
 0x22e   :  { %v1250_v49 = vadd.f32 %v1249_v15, %v1201_v21 }
 0x22f   :  { %v1153_v20 = vpop.f32.mrf.mxu1 }
 0x230   :  { %v1154_v50 = vadd.f32 %v1153_v20, %v1105_v16  ;;  %v1286_v40 = vmax.f32 %v1250_v49, 0.0 }
 0x231   :  { %v1207_v32 = vpop.f32.mrf.mxu2 }
 0x232   :  { %v1287_v33 = vmax.f32 %v1154_v50, 0.0  ;;  %v1208_v55 = vadd.f32 %v1207_v32, %v2697_v59  ;;  %v1114_v12 = vpop.f32.mrf.mxu0 }
 0x233   :  { %v1115_v48 = vadd.f32 %v1114_v12, %v2693_v7 }
 0x234   :  { %v1309_v51 = vpack.c.bf16 %v1287_v33, %v1285_v13 }
 0x235   :  { %v1251_v27 = vpop.f32.mrf.mxu3 }
 0x236   :  { %v1252_v28 = vadd.f32 %v1251_v27, %v1203_v34  ;;  %1477 = vmatmul.bf16.gmra.mxu0 %v1309_v51 }
 0x237   :  { %v1156_v30 = vpop.f32.mrf.mxu1 }
 0x238   :  { %v1288_v31 = vmax.f32 %v1252_v28, 0.0  ;;  %v1157_v10 = vadd.f32 %v1156_v30, %v1108_v37 }
 0x239   :  { %v1210_v17 = vpop.f32.mrf.mxu2 }
 0x23a   :  { %v1310_v35 = vpack.c.bf16 %v1288_v31, %v1286_v40  ;;  %v1289_v53 = vmax.f32 %v1157_v10, 0.0  ;;  %v1117_v2 = vpop.f32.mrf.mxu0  ;;  %v1211_v4 = vadd.f32 %v1210_v17, %v2697_v59 }
 0x23b   :  { %v1118_v16 = vadd.f32 %v1117_v2, %v2693_v7 }
 0x23c   :  { %1526 = vmatmul.bf16.gmra.mxu1 %v1310_v35  ;;  %v2732_v35 = vld [vmem:[%s2829_s8] ss:$0 sm:$0xff]  ;;  %s2283_s8 = smov [#allocation8]  }
 0x23d   :  { %v1254_v38 = vpop.f32.mrf.mxu3  ;;  %s1685_s19 = sshll.u32 %s2283_s8, 4  ;;  %s1686_s19 = int_to_ptr.vmem [resolvable:$true] %s1685_s19 }
 0x23e   :  { %v1255_v56 = vadd.f32 %v1254_v38, %v1206_v47 }
 0x23f   :  { %v1158_v42 = vpop.f32.mrf.mxu1 }
 0x240   :  { %v1159_v43 = vadd.f32 %v1158_v42, %v1110_v3  ;;  %v1290_v41 = vmax.f32 %v1255_v56, 0.0  ;;  %v1611_v42 = vlaneseq }
 0x241   :  { %v1212_v60 = vpop.f32.mrf.mxu2 }
 0x242   :  { %v1291_v54 = vmax.f32 %v1159_v43, 0.0  ;;  %v1213_v24 = vadd.f32 %v1212_v60, %v2697_v59  ;;  %v1119_v15 = vpop.f32.mrf.mxu0  ;;  %v2736_v17 = vand.u32 127, %v1611_v42 }
 0x243   :  { %v1120_v52 = vadd.f32 %v1119_v15, %v2693_v7 }
 0x244   :  { %v1311_v36 = vpack.c.bf16 %v1291_v54, %v1289_v53  ;;  %vm1614_vm0 = vcmp.lt.s32.totalorder %v2736_v17, 2  ;;  %vm1613_vm1 = vcmp.lt.s32.totalorder %v2736_v17, 1 }
 0x245   :  { %v1256_v6 = vpop.f32.mrf.mxu3 }
 0x246   :  { %v1257_v11 = vadd.f32 %v1256_v6, %v1208_v55  ;;  %1482 = vmatmul.bf16.gmra.mxu0 %v1311_v36 }
 0x247   :  { %v1161_v57 = vpop.f32.mrf.mxu1 }
 0x248   :  { %v1292_v58 = vmax.f32 %v1257_v11, 0.0  ;;  %v1162_v61 = vadd.f32 %v1161_v57, %v1113_v45 }
 0x249   :  { %v1215_v62 = vpop.f32.mrf.mxu2 }
 0x24a   :  { %v1312_v44 = vpack.c.bf16 %v1292_v58, %v1290_v41  ;;  %v1293_v23 = vmax.f32 %v1162_v61, 0.0  ;;  %v1216_v33 = vadd.f32 %v1215_v62, %v2697_v59 }
 0x24c   :  { %1531 = vmatmul.bf16.gmra.mxu1 %v1312_v44 }
 0x24d   :  { %v1259_v18 = vpop.f32.mrf.mxu3 }
 0x24e   :  { %v1260_v25 = vadd.f32 %v1259_v18, %v1211_v4 }
 0x24f   :  { %v1163_v63 = vpop.f32.mrf.mxu1 }
 0x250   :  { %v1164_v1 = vadd.f32 %v1163_v63, %v1115_v48  ;;  %v1294_v8 = vmax.f32 %v1260_v25, 0.0 }
 0x251   :  { %v1217_v13 = vpop.f32.mrf.mxu2 }
 0x252   :  { %v1295_v0 = vmax.f32 %v1164_v1, 0.0  ;;  %v1218_v49 = vadd.f32 %v1217_v13, %v2697_v59 }
 0x254   :  { %v1313_v5 = vpack.c.bf16 %v1295_v0, %v1293_v23 }
 0x255   :  { %v1261_v26 = vpop.f32.mrf.mxu3 }
 0x256   :  { %v1262_v46 = vadd.f32 %v1261_v26, %v1213_v24  ;;  %1487 = vmatmul.bf16.gmra.mxu0 %v1313_v5 }
 0x257   :  { %v1166_v29 = vpop.f32.mrf.mxu1 }
 0x258   :  { %v1296_v9 = vmax.f32 %v1262_v46, 0.0  ;;  %v1167_v20 = vadd.f32 %v1166_v29, %v1118_v16 }
 0x25a   :  { %v1314_v14 = vpack.c.bf16 %v1296_v9, %v1294_v8  ;;  %v1297_v22 = vmax.f32 %v1167_v20, 0.0 }
 0x25c   :  { %1536 = vmatmul.bf16.gmra.mxu1 %v1314_v14 }
 0x25d   :  { %v1264_v19 = vpop.f32.mrf.mxu3 }
 0x25e   :  { %v1265_v51 = vadd.f32 %v1264_v19, %v1216_v33 }
 0x25f   :  { %v1168_v50 = vpop.f32.mrf.mxu1 }
 0x260   :  { %v1169_v21 = vadd.f32 %v1168_v50, %v1120_v52  ;;  %v1298_v40 = vmax.f32 %v1265_v51, 0.0 }
 0x262   :  { %v1299_v34 = vmax.f32 %v1169_v21, 0.0 }
 0x264   :  { %v1315_v27 = vpack.c.bf16 %v1299_v34, %v1297_v22 }
 0x265   :  { %v1266_v28 = vpop.f32.mrf.mxu3 }
 0x266   :  { %v1267_v30 = vadd.f32 %v1266_v28, %v1218_v49  ;;  %1492 = vmatmul.bf16.gmra.mxu0 %v1315_v27 }
 0x268   :  { %v1300_v31 = vmax.f32 %v1267_v30, 0.0 }
 0x26a   :  { %v1316_v32 = vpack.c.bf16 %v1300_v31, %v1298_v40 }
 0x26c   :  { %1541 = vmatmul.bf16.gmra.mxu1 %v1316_v32 }
 0x273   :  { %v1458_v7 = vpop.f32.mrf.mxu0 }
 0x274   :  { %v1459_v37 = vadd.f32 %v2732_v35, %v1458_v7 }
 0x279   :  { %v1507_v39 = vpop.f32.mrf.mxu1 }
 0x27a   :  { %v1508_v38 = vadd.f32 %v1507_v39, %v1459_v37 }
 0x27b   :  { %v1460_v59 = vpop.f32.mrf.mxu0 }
 0x27c   :  { %v1547_v3 = vmax.f32 %v1508_v38, -20.0  ;;  %v1461_v47 = vadd.f32 %v2732_v35, %v1460_v59 }
 0x27e   :  { %v1563_v10 = vmin.f32 %v1547_v3, 2.0 }
 0x280   :  { %v1579_v43 = vmul.f32 1.442695, %v1563_v10 }
 0x281   :  { %v1509_v53 = vpop.f32.mrf.mxu1 }
 0x282   :  { %2142 = vpow2.f32 %v1579_v43  ;;  %v1510_v54 = vadd.f32 %v1509_v53, %v1461_v47 }
 0x283   :  { %v1463_v55 = vpop.f32.mrf.mxu0 }
 0x284   :  { %v1548_v56 = vmax.f32 %v1510_v54, -20.0  ;;  %v1464_v12 = vadd.f32 %v2732_v35, %v1463_v55 }
 0x286   :  { %v1564_v36 = vmin.f32 %v1548_v56, 2.0 }
 0x288   :  { %v2143_v6 = vpop.eup %2142  ;;  %v1581_v11 = vmul.f32 1.442695, %v1564_v36 }
 0x289   :  { %v1512_v57 = vpop.f32.mrf.mxu1  ;;  %v1615_v41 = vsel %vm1614_vm0, %v2143_v6, 0.0 }
 0x28a   :  { %2144 = vpow2.f32 %v1581_v11  ;;  %v1513_v58 = vadd.f32 %v1512_v57, %v1464_v12  ;;  %v1631_v44 = vsel %vm1613_vm1, %v1508_v38, %v1615_v41 }
 0x28b   :  { %v1465_v45 = vpop.f32.mrf.mxu0  ;;  %1647 = vxpose.xlu2.b32.start [1/16] (narrow) %v1631_v44, 8 }
 0x28c   :  { %v1549_v60 = vmax.f32 %v1513_v58, -20.0  ;;  %v1466_v63 = vadd.f32 %v2732_v35, %v1465_v45 }
 0x28e   :  { %v1565_v18 = vmin.f32 %v1549_v60, 2.0 }
 0x290   :  { %v2145_v48 = vpop.eup %2144  ;;  %v1583_v61 = vmul.f32 1.442695, %v1565_v18 }
 0x291   :  { %v1514_v1 = vpop.f32.mrf.mxu1  ;;  %v1616_v2 = vsel %vm1614_vm0, %v2145_v48, 0.0 }
 0x292   :  { %2146 = vpow2.f32 %v1583_v61  ;;  %v1515_v4 = vadd.f32 %v1514_v1, %v1466_v63  ;;  %v1632_v23 = vsel %vm1613_vm1, %v1510_v54, %v1616_v2 }
 0x293   :  { %v1468_v0 = vpop.f32.mrf.mxu0  ;;  %1648 = vxpose.xlu2.b32.cont [2/16] (narrow) %v1632_v23, 8 }
 0x294   :  { %v1550_v24 = vmax.f32 %v1515_v4, -20.0  ;;  %v1469_v46 = vadd.f32 %v2732_v35, %v1468_v0 }
 0x296   :  { %v1566_v25 = vmin.f32 %v1550_v24, 2.0 }
 0x298   :  { %v2147_v5 = vpop.eup %2146  ;;  %v1585_v26 = vmul.f32 1.442695, %v1566_v25 }
 0x299   :  { %v1517_v62 = vpop.f32.mrf.mxu1  ;;  %v1617_v29 = vsel %vm1614_vm0, %v2147_v5, 0.0 }
 0x29a   :  { %2148 = vpow2.f32 %v1585_v26  ;;  %v1518_v8 = vadd.f32 %v1517_v62, %v1469_v46  ;;  %v1633_v9 = vsel %vm1613_vm1, %v1513_v58, %v1617_v29 }
 0x29b   :  { %v1470_v14 = vpop.f32.mrf.mxu0  ;;  %1649 = vxpose.xlu2.b32.cont [3/16] (narrow) %v1633_v9, 8 }
 0x29c   :  { %v1551_v15 = vmax.f32 %v1518_v8, -20.0  ;;  %v1471_v20 = vadd.f32 %v2732_v35, %v1470_v14 }
 0x29e   :  { %v1567_v16 = vmin.f32 %v1551_v15, 2.0 }
 0x2a0   :  { %v2149_v19 = vpop.eup %2148  ;;  %v1587_v52 = vmul.f32 1.442695, %v1567_v16 }
 0x2a1   :  { %v1519_v50 = vpop.f32.mrf.mxu1  ;;  %v1618_v21 = vsel %vm1614_vm0, %v2149_v19, 0.0 }
 0x2a2   :  { %2150 = vpow2.f32 %v1587_v52  ;;  %v1520_v13 = vadd.f32 %v1519_v50, %v1471_v20  ;;  %v1634_v33 = vsel %vm1613_vm1, %v1515_v4, %v1618_v21 }
 0x2a3   :  { %1650 = vxpose.xlu2.b32.cont [4/16] (narrow) %v1634_v33, 8  ;;  %v1473_v22 = vpop.f32.mrf.mxu0 }
 0x2a4   :  { %v1552_v34 = vmax.f32 %v1520_v13, -20.0  ;;  %v1474_v28 = vadd.f32 %v2732_v35, %v1473_v22 }
 0x2a6   :  { %v1568_v49 = vmin.f32 %v1552_v34, 2.0 }
 0x2a8   :  { %v2151_v51 = vpop.eup %2150  ;;  %v1589_v27 = vmul.f32 1.442695, %v1568_v49 }
 0x2a9   :  { %v1522_v30 = vpop.f32.mrf.mxu1  ;;  %v1619_v40 = vsel %vm1614_vm0, %v2151_v51, 0.0 }
 0x2aa   :  { %2152 = vpow2.f32 %v1589_v27  ;;  %v1523_v31 = vadd.f32 %v1522_v30, %v1474_v28  ;;  %v1635_v32 = vsel %vm1613_vm1, %v1518_v8, %v1619_v40 }
 0x2ab   :  { %1651 = vxpose.xlu2.b32.cont [5/16] (narrow) %v1635_v32, 8  ;;  %v1475_v7 = vpop.f32.mrf.mxu0 }
 0x2ac   :  { %v1553_v37 = vmax.f32 %v1523_v31, -20.0  ;;  %v1476_v3 = vadd.f32 %v2732_v35, %v1475_v7 }
 0x2ae   :  { %v1569_v39 = vmin.f32 %v1553_v37, 2.0 }
 0x2b0   :  { %v2153_v38 = vpop.eup %2152  ;;  %v1591_v59 = vmul.f32 1.442695, %v1569_v39 }
 0x2b1   :  { %v1524_v10 = vpop.f32.mrf.mxu1  ;;  %v1620_v42 = vsel %vm1614_vm0, %v2153_v38, 0.0 }
 0x2b2   :  { %2154 = vpow2.f32 %v1591_v59  ;;  %v1525_v43 = vadd.f32 %v1524_v10, %v1476_v3  ;;  %v1636_v47 = vsel %vm1613_vm1, %v1520_v13, %v1620_v42 }
 0x2b3   :  { %1652 = vxpose.xlu2.b32.cont [6/16] (narrow) %v1636_v47, 8  ;;  %v1478_v53 = vpop.f32.mrf.mxu0 }
 0x2b4   :  { %v1554_v54 = vmax.f32 %v1525_v43, -20.0  ;;  %v1479_v6 = vadd.f32 %v2732_v35, %v1478_v53 }
 0x2b6   :  { %v1570_v55 = vmin.f32 %v1554_v54, 2.0 }
 0x2b8   :  { %v2155_v56 = vpop.eup %2154  ;;  %v1593_v36 = vmul.f32 1.442695, %v1570_v55 }
 0x2b9   :  { %v1527_v11 = vpop.f32.mrf.mxu1  ;;  %v1621_v12 = vsel %vm1614_vm0, %v2155_v56, 0.0 }
 0x2ba   :  { %2156 = vpow2.f32 %v1593_v36  ;;  %v1528_v57 = vadd.f32 %v1527_v11, %v1479_v6  ;;  %v1637_v41 = vsel %vm1613_vm1, %v1523_v31, %v1621_v12 }
 0x2bb   :  { %v1480_v58 = vpop.f32.mrf.mxu0  ;;  %1653 = vxpose.xlu2.b32.cont [7/16] (narrow) %v1637_v41, 8 }
 0x2bc   :  { %v1555_v44 = vmax.f32 %v1528_v57, -20.0  ;;  %v1481_v48 = vadd.f32 %v2732_v35, %v1480_v58 }
 0x2be   :  { %v1571_v45 = vmin.f32 %v1555_v44, 2.0 }
 0x2c0   :  { %v2157_v60 = vpop.eup %2156  ;;  %v1595_v18 = vmul.f32 1.442695, %v1571_v45 }
 0x2c1   :  { %v1529_v61 = vpop.f32.mrf.mxu1  ;;  %v1622_v63 = vsel %vm1614_vm0, %v2157_v60, 0.0 }
 0x2c2   :  { %2158 = vpow2.f32 %v1595_v18  ;;  %v1530_v1 = vadd.f32 %v1529_v61, %v1481_v48  ;;  %v1638_v2 = vsel %vm1613_vm1, %v1525_v43, %v1622_v63 }
 0x2c3   :  { %v1483_v4 = vpop.f32.mrf.mxu0  ;;  %1654 = vxpose.xlu2.b32.cont [8/16] (narrow) %v1638_v2, 8 }
 0x2c4   :  { %v1556_v23 = vmax.f32 %v1530_v1, -20.0  ;;  %v1484_v5 = vadd.f32 %v2732_v35, %v1483_v4 }
 0x2c6   :  { %v1572_v0 = vmin.f32 %v1556_v23, 2.0 }
 0x2c8   :  { %v2159_v24 = vpop.eup %2158  ;;  %v1597_v25 = vmul.f32 1.442695, %v1572_v0 }
 0x2c9   :  { %v1532_v26 = vpop.f32.mrf.mxu1  ;;  %v1623_v46 = vsel %vm1614_vm0, %v2159_v24, 0.0 }
 0x2ca   :  { %2160 = vpow2.f32 %v1597_v25  ;;  %v1533_v62 = vadd.f32 %v1532_v26, %v1484_v5  ;;  %v1639_v29 = vsel %vm1613_vm1, %v1528_v57, %v1623_v46 }
 0x2cb   :  { %v1485_v8 = vpop.f32.mrf.mxu0  ;;  %1655 = vxpose.xlu2.b32.cont [9/16] (narrow) %v1639_v29, 8 }
 0x2cc   :  { %v1557_v9 = vmax.f32 %v1533_v62, -20.0  ;;  %v1486_v19 = vadd.f32 %v2732_v35, %v1485_v8 }
 0x2ce   :  { %v1573_v14 = vmin.f32 %v1557_v9, 2.0 }
 0x2d0   :  { %v2161_v15 = vpop.eup %2160  ;;  %v1599_v16 = vmul.f32 1.442695, %v1573_v14 }
 0x2d1   :  { %v1534_v52 = vpop.f32.mrf.mxu1  ;;  %v1624_v20 = vsel %vm1614_vm0, %v2161_v15, 0.0 }
 0x2d2   :  { %2162 = vpow2.f32 %v1599_v16  ;;  %v1535_v50 = vadd.f32 %v1534_v52, %v1486_v19  ;;  %v1640_v21 = vsel %vm1613_vm1, %v1530_v1, %v1624_v20 }
 0x2d3   :  { %v1488_v13 = vpop.f32.mrf.mxu0  ;;  %1656 = vxpose.xlu2.b32.cont [10/16] (narrow) %v1640_v21, 8 }
 0x2d4   :  { %v1558_v33 = vmax.f32 %v1535_v50, -20.0  ;;  %v1489_v51 = vadd.f32 %v2732_v35, %v1488_v13 }
 0x2d6   :  { %v1574_v22 = vmin.f32 %v1558_v33, 2.0 }
 0x2d8   :  { %v2163_v34 = vpop.eup %2162  ;;  %v1601_v49 = vmul.f32 1.442695, %v1574_v22 }
 0x2d9   :  { %v1537_v27 = vpop.f32.mrf.mxu1  ;;  %v1625_v28 = vsel %vm1614_vm0, %v2163_v34, 0.0 }
 0x2da   :  { %2164 = vpow2.f32 %v1601_v49  ;;  %v1538_v30 = vadd.f32 %v1537_v27, %v1489_v51  ;;  %v1641_v40 = vsel %vm1613_vm1, %v1533_v62, %v1625_v28 }
 0x2db   :  { %v1490_v31 = vpop.f32.mrf.mxu0  ;;  %1657 = vxpose.xlu2.b32.cont [11/16] (narrow) %v1641_v40, 8 }
 0x2dc   :  { %v1559_v32 = vmax.f32 %v1538_v30, -20.0  ;;  %v1491_v38 = vadd.f32 %v2732_v35, %v1490_v31 }
 0x2de   :  { %v1575_v7 = vmin.f32 %v1559_v32, 2.0 }
 0x2e0   :  { %v2165_v37 = vpop.eup %2164  ;;  %v1603_v39 = vmul.f32 1.442695, %v1575_v7 }
 0x2e1   :  { %v1539_v59 = vpop.f32.mrf.mxu1  ;;  %v1626_v3 = vsel %vm1614_vm0, %v2165_v37, 0.0 }
 0x2e2   :  { %2166 = vpow2.f32 %v1603_v39  ;;  %v1540_v10 = vadd.f32 %v1539_v59, %v1491_v38  ;;  %v1642_v42 = vsel %vm1613_vm1, %v1535_v50, %v1626_v3 }
 0x2e3   :  { %v1493_v43 = vpop.f32.mrf.mxu0  ;;  %1658 = vxpose.xlu2.b32.cont [12/16] (narrow) %v1642_v42, 8 }
 0x2e4   :  { %v1560_v47 = vmax.f32 %v1540_v10, -20.0  ;;  %v1494_v56 = vadd.f32 %v2732_v35, %v1493_v43 }
 0x2e6   :  { %v1576_v53 = vmin.f32 %v1560_v47, 2.0 }
 0x2e8   :  { %v2167_v54 = vpop.eup %2166  ;;  %v1605_v55 = vmul.f32 1.442695, %v1576_v53 }
 0x2e9   :  { %v1542_v36 = vpop.f32.mrf.mxu1  ;;  %v1627_v6 = vsel %vm1614_vm0, %v2167_v54, 0.0 }
 0x2ea   :  { %2168 = vpow2.f32 %v1605_v55  ;;  %v1543_v11 = vadd.f32 %v1542_v36, %v1494_v56  ;;  %v1643_v12 = vsel %vm1613_vm1, %v1538_v30, %v1627_v6 }
 0x2eb   :  { %1659 = vxpose.xlu2.b32.cont [13/16] (narrow) %v1643_v12, 8  ;;  %v1495_v41 = vpop.f32.mrf.mxu0 }
 0x2ec   :  { %v1561_v57 = vmax.f32 %v1543_v11, -20.0  ;;  %v1496_v60 = vadd.f32 %v2732_v35, %v1495_v41 }
 0x2ee   :  { %v1577_v58 = vmin.f32 %v1561_v57, 2.0 }
 0x2f0   :  { %v2169_v44 = vpop.eup %2168  ;;  %v1607_v45 = vmul.f32 1.442695, %v1577_v58 }
 0x2f1   :  { %v1544_v18 = vpop.f32.mrf.mxu1  ;;  %v1628_v48 = vsel %vm1614_vm0, %v2169_v44, 0.0 }
 0x2f2   :  { %2170 = vpow2.f32 %v1607_v45  ;;  %v1545_v61 = vadd.f32 %v1544_v18, %v1496_v60  ;;  %v1644_v63 = vsel %vm1613_vm1, %v1540_v10, %v1628_v48 }
 0x2f3   :  { %1660 = vxpose.xlu2.b32.cont [14/16] (narrow) %v1644_v63, 8 }
 0x2f4   :  { %v1562_v1 = vmax.f32 %v1545_v61, -20.0 }
 0x2f6   :  { %v1578_v2 = vmin.f32 %v1562_v1, 2.0 }
 0x2f8   :  { %v2171_v4 = vpop.eup %2170  ;;  %v1609_v23 = vmul.f32 1.442695, %v1578_v2 }
 0x2f9   :  { %v1629_v0 = vsel %vm1614_vm0, %v2171_v4, 0.0 }
 0x2fa   :  { %2172 = vpow2.f32 %v1609_v23  ;;  %v1645_v35 = vsel %vm1613_vm1, %v1543_v11, %v1629_v0 }
 0x2fb   :  { %1661 = vxpose.xlu2.b32.cont [15/16] (narrow) %v1645_v35, 8 }
 0x300   :  { %v2173_v24 = vpop.eup %2172 }
 0x301   :  { %v1630_v25 = vsel %vm1614_vm0, %v2173_v24, 0.0 }
 0x302   :  { %v1646_v5 = vsel %vm1613_vm1, %v1545_v61, %v1630_v25 }
 0x303   :  { %1662 = vxpose.xlu2.b32.end [16/16] (narrow) %v1646_v5, 8 }
 0x324   :  { %v1663_v26 = vpop.trf.xlu2 }
 0x325   :  { %1679 = vst [vmem:[#allocation8] sm:$0xff] %v1663_v26 }
 0x326   :  { %1690 = dma.vmem_to_hbm [thread:$0]  %s1686_s19, 128, %s1688_s22, [#allocation4]  }
 0x327   :  { %2274 = dma.done.wait [#allocation4], 128  }
 0x328   :  { %2275 = vsyncadd [#allocation4], 4294967168 }
 0x329   :  { %1695 = vsyncpa [#allocation3], 1 }
 0x32a   :  { %1696 = vsyncpa [#allocation6], 1 }
 0x32b   :  { %1697 = vsyncpa [#allocation4], 1 }

</bundles_post_ra>
